<compile_context>
chip_gen: v6e
topology: v6e:2x2x1
jax: 0.10.0
libtpu: 0.0.40
codegen_flags: <defaults>
</compile_context>

<pallas_src>
import jax
import jax.numpy as jnp
import numpy as np
from jax.experimental import pallas as pl
from jax.experimental.pallas import tpu as pltpu


def _conway_kernel(w1_ref, b1_ref, w2_ref, b2_ref, x_ref, out_ref):
    # x_ref  : (Bblk, H, W)  VMEM  raw input (no pre-padding)
    # out_ref: (Bblk, H, W)  VMEM  torus core of the output (border built in wrapper)
    # w1_ref : (27,) SMEM  conv1 weight, (3,1,3,3) flattened OIHW, f32
    # b1_ref : (3,)  SMEM
    # w2_ref : (3,)  SMEM  conv2 weight, (1,3,1,1) flattened
    # b2_ref : (1,)  SMEM
    _, H, W = x_ref.shape
    x = x_ref[...]  # (Bblk, H, W) f32

    # Wrap-padded value: xp[:, i, j] == x[:, (i-2) % H, (j-2) % W].
    # Equivalent to pltpu.roll-based torus shifts (roll == concat of slices);
    # built once as a value, so there are no scratch refs and no masked
    # narrow halo stores.  Each 3x3 tap is then a free static slice of xp.
    xr = jnp.concatenate([x[:, H - 2:, :], x], axis=1)     # (Bblk, H+2, W)
    xp = jnp.concatenate([xr[:, :, W - 2:], xr], axis=2)   # (Bblk, H+2, W+2)

    # Tap-outer loop: one shifted (H, W) window live at a time, shared by the
    # 3 output channels via 3 accumulators.  conv1 (1->3, 3x3) fused with the
    # 1x1 conv2 mixing below.
    acc = [None, None, None]
    for dh in range(3):
        for dw in range(3):
            win = xp[:, dh:dh + H, dw:dw + W]               # (Bblk, H, W)
            t = dh * 3 + dw
            for c in range(3):
                term = w1_ref[c * 9 + t] * win
                acc[c] = term if acc[c] is None else acc[c] + term

    # sigmoid as exp (EUP) + reciprocal, fused with conv2 (3->1, 1x1) + sigmoid.
    # TODO(synk): flip to pl.reciprocal(..., approx=True) (EUP vrcp) once the
    # approximation is verified against the 1e-5 test tolerance on hardware.
    mix = None
    for c in range(3):
        s = pl.reciprocal(1.0 + jnp.exp(-(acc[c] + b1_ref[c])), approx=False)
        term = w2_ref[c] * s
        mix = term if mix is None else mix + term
    out_ref[...] = pl.reciprocal(1.0 + jnp.exp(-(mix + b2_ref[0])), approx=False)


def neural_conway_pallas(x, w1, b1, w2, b2, *, vmem_budget_bytes=8 << 20):
    """x: (B, H, W) f32 -> (B, H+2, W+2) f32 (NeuralConway forward)."""
    B, H, W = x.shape
    assert H >= 2 and W >= 2, "circular padding=2 requires H, W >= 2"

    x = x.astype(jnp.float32)
    w1_flat = w1.reshape(-1).astype(jnp.float32)   # (27,)
    b1_flat = b1.reshape(-1).astype(jnp.float32)   # (3,)
    w2_flat = w2.reshape(-1).astype(jnp.float32)   # (3,)
    b2_flat = b2.reshape(-1).astype(jnp.float32)   # (1,)

    # Batch-block size: biggest block whose working set (double-buffered
    # in/out + padded value + window + 3 accumulators, ~10 block-sized
    # temporaries) fits a conservative VMEM budget.  Demo -> one grid step.
    bytes_per_item = (H + 2) * (W + 2) * 4 * 10
    b_blk = int(max(1, min(B, vmem_budget_bytes // max(bytes_per_item, 1))))
    grid = (pl.cdiv(B, b_blk),)

    smem_spec = pl.BlockSpec(memory_space=pltpu.MemorySpace.SMEM)

    core = pl.pallas_call(
        _conway_kernel,
        out_shape=jax.ShapeDtypeStruct((B, H, W), jnp.float32),
        grid=grid,
        in_specs=[
            smem_spec,  # w1
            smem_spec,  # b1
            smem_spec,  # w2
            smem_spec,  # b2
            pl.BlockSpec((b_blk, H, W), lambda i: (i, 0, 0)),   # input boards
        ],
        out_specs=pl.BlockSpec((b_blk, H, W), lambda i: (i, 0, 0)),
        compiler_params=pltpu.CompilerParams(
            dimension_semantics=("parallel",)),
    )(w1_flat, b1_flat, w2_flat, b2_flat, x)

    # The circularly-padded conv output is periodic: rows H, H+1 equal rows
    # 0, 1 and cols W, W+1 equal cols 0, 1.  Build the (H+2, W+2) output from
    # the (H, W) core with two cheap wrapper-side concats.
    rows = jnp.concatenate([core, core[:, :2, :]], axis=1)      # (B, H+2, W)
    return jnp.concatenate([rows, rows[:, :, :2]], axis=2)      # (B, H+2, W+2)


def neural_conway_ref(x, w1, b1, w2, b2):
    """Pure-JAX reference mirroring the PyTorch forward (NCHW convs)."""
    xp = jnp.pad(x[:, None, :, :], ((0, 0), (0, 0), (2, 2), (2, 2)), mode="wrap")
    y = jax.lax.conv_general_dilated(
        xp, w1, window_strides=(1, 1), padding="VALID",
        dimension_numbers=("NCHW", "OIHW", "NCHW"))
    y = jax.nn.sigmoid(y + b1[None, :, None, None])
    z = jax.lax.conv_general_dilated(
        y, w2, window_strides=(1, 1), padding="VALID",
        dimension_numbers=("NCHW", "OIHW", "NCHW"))
    z = jax.nn.sigmoid(z + b2[None, :, None, None])
    return z[:, 0]


if __name__ == "__main__":
    # Deterministic parameters (shapes from NeuralConway.__init__; values from
    # load_conway_weights with multiplier=1.0 to stay in a non-saturated regime).
    mult = 1.0
    w1 = jnp.asarray(np.array(
        [[[[-1., -1., -1.], [-1., -1., -1.], [-1., -1., -1.]]],
         [[[-1., -1., -1.], [-1., -1., -1.], [-1., -1., -1.]]],
         [[[ 1.,  1.,  1.], [ 1.,  0.,  1.], [ 1.,  1.,  1.]]]],
        dtype=np.float32)) * mult                     # (3,1,3,3)
    b1 = jnp.asarray([2.5, 2.5, -3.5], jnp.float32) * mult        # (3,)
    w2 = jnp.asarray(np.array(
        [[[[-1.]], [[-1.]], [[-2.]]]], dtype=np.float32)) * mult  # (1,3,1,1)
    b2 = jnp.asarray([0.5], jnp.float32) * mult                   # (1,)

    # Deterministic example input: a small 0/1 "Game of Life" board.
    B, H, W = 2, 16, 16
    key = jax.random.PRNGKey(0)
    x = jax.random.bernoulli(key, p=0.4, shape=(B, H, W)).astype(jnp.float32)

    out = neural_conway_pallas(x, w1, b1, w2, b2)
    out = jax.block_until_ready(out)

    ref = neural_conway_ref(x, w1, b1, w2, b2)
    assert out.shape == (B, H + 2, W + 2), out.shape
    np.testing.assert_allclose(np.asarray(out), np.asarray(ref),
                               rtol=1e-5, atol=1e-5)

    print("KERNEL_OK")
</pallas_src>

<mosaic_0001>
module attributes {stable_mosaic.version = 11 : i64} {
  func.func @_conway_kernel(%arg0: i32, %arg1: memref<27xf32, #tpu.memory_space<smem>>, %arg2: memref<3xf32, #tpu.memory_space<smem>>, %arg3: memref<3xf32, #tpu.memory_space<smem>>, %arg4: memref<1xf32, #tpu.memory_space<smem>>, %arg5: memref<2x16x16xf32, #tpu.memory_space<vmem>>, %arg6: memref<2x16x16xf32, #tpu.memory_space<vmem>>) attributes {dimension_semantics = [#tpu.dimension_semantics<parallel>], iteration_bounds = array<i64: 1>, scalar_prefetch = 0 : i64, scratch_operands = 0 : i64, tpu.core_type = #tpu.core_type<tc>, window_params = [{transform_indices = @transform_0, window_bounds = array<i64: 27>}, {transform_indices = @transform_1, window_bounds = array<i64: 3>}, {transform_indices = @transform_2, window_bounds = array<i64: 3>}, {transform_indices = @transform_3, window_bounds = array<i64: 1>}, {transform_indices = @transform_4, window_bounds = array<i64: 2, 16, 16>}, {transform_indices = @transform_5, window_bounds = array<i64: 2, 16, 16>}]} {
    %c0 = arith.constant 0 : index
    %c0_0 = arith.constant 0 : index
    %c0_1 = arith.constant 0 : index
    %0 = vector.load %arg5[%c0, %c0_0, %c0_1] : memref<2x16x16xf32, #tpu.memory_space<vmem>>, vector<2x16x16xf32>
    %1 = vector.extract_strided_slice %0 {offsets = [0, 14, 0], sizes = [2, 2, 16], strides = [1, 1, 1]} : vector<2x16x16xf32> to vector<2x2x16xf32>
    %2 = tpu.concatenate %1, %0 in 1 : vector<2x2x16xf32>, vector<2x16x16xf32> -> vector<2x18x16xf32>
    %3 = vector.extract_strided_slice %2 {offsets = [0, 0, 14], sizes = [2, 18, 2], strides = [1, 1, 1]} : vector<2x18x16xf32> to vector<2x18x2xf32>
    %4 = tpu.concatenate %3, %2 in 2 : vector<2x18x2xf32>, vector<2x18x16xf32> -> vector<2x18x18xf32>
    %5 = vector.extract_strided_slice %4 {offsets = [0, 0, 0], sizes = [2, 16, 16], strides = [1, 1, 1]} : vector<2x18x18xf32> to vector<2x16x16xf32>
    %c0_2 = arith.constant 0 : index
    %6 = memref.load %arg1[%c0_2] : memref<27xf32, #tpu.memory_space<smem>>
    %7 = vector.broadcast %6 : f32 to vector<2x16x16xf32>
    %8 = arith.mulf %7, %5 : vector<2x16x16xf32>
    %c9 = arith.constant 9 : index
    %9 = memref.load %arg1[%c9] : memref<27xf32, #tpu.memory_space<smem>>
    %10 = vector.broadcast %9 : f32 to vector<2x16x16xf32>
    %11 = arith.mulf %10, %5 : vector<2x16x16xf32>
    %c18 = arith.constant 18 : index
    %12 = memref.load %arg1[%c18] : memref<27xf32, #tpu.memory_space<smem>>
    %13 = vector.broadcast %12 : f32 to vector<2x16x16xf32>
    %14 = arith.mulf %13, %5 : vector<2x16x16xf32>
    %15 = vector.extract_strided_slice %4 {offsets = [0, 0, 1], sizes = [2, 16, 16], strides = [1, 1, 1]} : vector<2x18x18xf32> to vector<2x16x16xf32>
    %c1 = arith.constant 1 : index
    %16 = memref.load %arg1[%c1] : memref<27xf32, #tpu.memory_space<smem>>
    %17 = vector.broadcast %16 : f32 to vector<2x16x16xf32>
    %18 = arith.mulf %17, %15 : vector<2x16x16xf32>
    %19 = arith.addf %8, %18 : vector<2x16x16xf32>
    %c10 = arith.constant 10 : index
    %20 = memref.load %arg1[%c10] : memref<27xf32, #tpu.memory_space<smem>>
    %21 = vector.broadcast %20 : f32 to vector<2x16x16xf32>
    %22 = arith.mulf %21, %15 : vector<2x16x16xf32>
    %23 = arith.addf %11, %22 : vector<2x16x16xf32>
    %c19 = arith.constant 19 : index
    %24 = memref.load %arg1[%c19] : memref<27xf32, #tpu.memory_space<smem>>
    %25 = vector.broadcast %24 : f32 to vector<2x16x16xf32>
    %26 = arith.mulf %25, %15 : vector<2x16x16xf32>
    %27 = arith.addf %14, %26 : vector<2x16x16xf32>
    %28 = vector.extract_strided_slice %4 {offsets = [0, 0, 2], sizes = [2, 16, 16], strides = [1, 1, 1]} : vector<2x18x18xf32> to vector<2x16x16xf32>
    %c2 = arith.constant 2 : index
    %29 = memref.load %arg1[%c2] : memref<27xf32, #tpu.memory_space<smem>>
    %30 = vector.broadcast %29 : f32 to vector<2x16x16xf32>
    %31 = arith.mulf %30, %28 : vector<2x16x16xf32>
    %32 = arith.addf %19, %31 : vector<2x16x16xf32>
    %c11 = arith.constant 11 : index
    %33 = memref.load %arg1[%c11] : memref<27xf32, #tpu.memory_space<smem>>
    %34 = vector.broadcast %33 : f32 to vector<2x16x16xf32>
    %35 = arith.mulf %34, %28 : vector<2x16x16xf32>
    %36 = arith.addf %23, %35 : vector<2x16x16xf32>
    %c20 = arith.constant 20 : index
    %37 = memref.load %arg1[%c20] : memref<27xf32, #tpu.memory_space<smem>>
    %38 = vector.broadcast %37 : f32 to vector<2x16x16xf32>
    %39 = arith.mulf %38, %28 : vector<2x16x16xf32>
    %40 = arith.addf %27, %39 : vector<2x16x16xf32>
    %41 = vector.extract_strided_slice %4 {offsets = [0, 1, 0], sizes = [2, 16, 16], strides = [1, 1, 1]} : vector<2x18x18xf32> to vector<2x16x16xf32>
    %c3 = arith.constant 3 : index
    %42 = memref.load %arg1[%c3] : memref<27xf32, #tpu.memory_space<smem>>
    %43 = vector.broadcast %42 : f32 to vector<2x16x16xf32>
    %44 = arith.mulf %43, %41 : vector<2x16x16xf32>
    %45 = arith.addf %32, %44 : vector<2x16x16xf32>
    %c12 = arith.constant 12 : index
    %46 = memref.load %arg1[%c12] : memref<27xf32, #tpu.memory_space<smem>>
    %47 = vector.broadcast %46 : f32 to vector<2x16x16xf32>
    %48 = arith.mulf %47, %41 : vector<2x16x16xf32>
    %49 = arith.addf %36, %48 : vector<2x16x16xf32>
    %c21 = arith.constant 21 : index
    %50 = memref.load %arg1[%c21] : memref<27xf32, #tpu.memory_space<smem>>
    %51 = vector.broadcast %50 : f32 to vector<2x16x16xf32>
    %52 = arith.mulf %51, %41 : vector<2x16x16xf32>
    %53 = arith.addf %40, %52 : vector<2x16x16xf32>
    %54 = vector.extract_strided_slice %4 {offsets = [0, 1, 1], sizes = [2, 16, 16], strides = [1, 1, 1]} : vector<2x18x18xf32> to vector<2x16x16xf32>
    %c4 = arith.constant 4 : index
    %55 = memref.load %arg1[%c4] : memref<27xf32, #tpu.memory_space<smem>>
    %56 = vector.broadcast %55 : f32 to vector<2x16x16xf32>
    %57 = arith.mulf %56, %54 : vector<2x16x16xf32>
    %58 = arith.addf %45, %57 : vector<2x16x16xf32>
    %c13 = arith.constant 13 : index
    %59 = memref.load %arg1[%c13] : memref<27xf32, #tpu.memory_space<smem>>
    %60 = vector.broadcast %59 : f32 to vector<2x16x16xf32>
    %61 = arith.mulf %60, %54 : vector<2x16x16xf32>
    %62 = arith.addf %49, %61 : vector<2x16x16xf32>
    %c22 = arith.constant 22 : index
    %63 = memref.load %arg1[%c22] : memref<27xf32, #tpu.memory_space<smem>>
    %64 = vector.broadcast %63 : f32 to vector<2x16x16xf32>
    %65 = arith.mulf %64, %54 : vector<2x16x16xf32>
    %66 = arith.addf %53, %65 : vector<2x16x16xf32>
    %67 = vector.extract_strided_slice %4 {offsets = [0, 1, 2], sizes = [2, 16, 16], strides = [1, 1, 1]} : vector<2x18x18xf32> to vector<2x16x16xf32>
    %c5 = arith.constant 5 : index
    %68 = memref.load %arg1[%c5] : memref<27xf32, #tpu.memory_space<smem>>
    %69 = vector.broadcast %68 : f32 to vector<2x16x16xf32>
    %70 = arith.mulf %69, %67 : vector<2x16x16xf32>
    %71 = arith.addf %58, %70 : vector<2x16x16xf32>
    %c14 = arith.constant 14 : index
    %72 = memref.load %arg1[%c14] : memref<27xf32, #tpu.memory_space<smem>>
    %73 = vector.broadcast %72 : f32 to vector<2x16x16xf32>
    %74 = arith.mulf %73, %67 : vector<2x16x16xf32>
    %75 = arith.addf %62, %74 : vector<2x16x16xf32>
    %c23 = arith.constant 23 : index
    %76 = memref.load %arg1[%c23] : memref<27xf32, #tpu.memory_space<smem>>
    %77 = vector.broadcast %76 : f32 to vector<2x16x16xf32>
    %78 = arith.mulf %77, %67 : vector<2x16x16xf32>
    %79 = arith.addf %66, %78 : vector<2x16x16xf32>
    %80 = vector.extract_strided_slice %4 {offsets = [0, 2, 0], sizes = [2, 16, 16], strides = [1, 1, 1]} : vector<2x18x18xf32> to vector<2x16x16xf32>
    %c6 = arith.constant 6 : index
    %81 = memref.load %arg1[%c6] : memref<27xf32, #tpu.memory_space<smem>>
    %82 = vector.broadcast %81 : f32 to vector<2x16x16xf32>
    %83 = arith.mulf %82, %80 : vector<2x16x16xf32>
    %84 = arith.addf %71, %83 : vector<2x16x16xf32>
    %c15 = arith.constant 15 : index
    %85 = memref.load %arg1[%c15] : memref<27xf32, #tpu.memory_space<smem>>
    %86 = vector.broadcast %85 : f32 to vector<2x16x16xf32>
    %87 = arith.mulf %86, %80 : vector<2x16x16xf32>
    %88 = arith.addf %75, %87 : vector<2x16x16xf32>
    %c24 = arith.constant 24 : index
    %89 = memref.load %arg1[%c24] : memref<27xf32, #tpu.memory_space<smem>>
    %90 = vector.broadcast %89 : f32 to vector<2x16x16xf32>
    %91 = arith.mulf %90, %80 : vector<2x16x16xf32>
    %92 = arith.addf %79, %91 : vector<2x16x16xf32>
    %93 = vector.extract_strided_slice %4 {offsets = [0, 2, 1], sizes = [2, 16, 16], strides = [1, 1, 1]} : vector<2x18x18xf32> to vector<2x16x16xf32>
    %c7 = arith.constant 7 : index
    %94 = memref.load %arg1[%c7] : memref<27xf32, #tpu.memory_space<smem>>
    %95 = vector.broadcast %94 : f32 to vector<2x16x16xf32>
    %96 = arith.mulf %95, %93 : vector<2x16x16xf32>
    %97 = arith.addf %84, %96 : vector<2x16x16xf32>
    %c16 = arith.constant 16 : index
    %98 = memref.load %arg1[%c16] : memref<27xf32, #tpu.memory_space<smem>>
    %99 = vector.broadcast %98 : f32 to vector<2x16x16xf32>
    %100 = arith.mulf %99, %93 : vector<2x16x16xf32>
    %101 = arith.addf %88, %100 : vector<2x16x16xf32>
    %c25 = arith.constant 25 : index
    %102 = memref.load %arg1[%c25] : memref<27xf32, #tpu.memory_space<smem>>
    %103 = vector.broadcast %102 : f32 to vector<2x16x16xf32>
    %104 = arith.mulf %103, %93 : vector<2x16x16xf32>
    %105 = arith.addf %92, %104 : vector<2x16x16xf32>
    %106 = vector.extract_strided_slice %4 {offsets = [0, 2, 2], sizes = [2, 16, 16], strides = [1, 1, 1]} : vector<2x18x18xf32> to vector<2x16x16xf32>
    %c8 = arith.constant 8 : index
    %107 = memref.load %arg1[%c8] : memref<27xf32, #tpu.memory_space<smem>>
    %108 = vector.broadcast %107 : f32 to vector<2x16x16xf32>
    %109 = arith.mulf %108, %106 : vector<2x16x16xf32>
    %110 = arith.addf %97, %109 : vector<2x16x16xf32>
    %c17 = arith.constant 17 : index
    %111 = memref.load %arg1[%c17] : memref<27xf32, #tpu.memory_space<smem>>
    %112 = vector.broadcast %111 : f32 to vector<2x16x16xf32>
    %113 = arith.mulf %112, %106 : vector<2x16x16xf32>
    %114 = arith.addf %101, %113 : vector<2x16x16xf32>
    %c26 = arith.constant 26 : index
    %115 = memref.load %arg1[%c26] : memref<27xf32, #tpu.memory_space<smem>>
    %116 = vector.broadcast %115 : f32 to vector<2x16x16xf32>
    %117 = arith.mulf %116, %106 : vector<2x16x16xf32>
    %118 = arith.addf %105, %117 : vector<2x16x16xf32>
    %c0_3 = arith.constant 0 : index
    %119 = memref.load %arg2[%c0_3] : memref<3xf32, #tpu.memory_space<smem>>
    %120 = vector.broadcast %119 : f32 to vector<2x16x16xf32>
    %121 = arith.addf %110, %120 : vector<2x16x16xf32>
    %cst = arith.constant 0.000000e+00 : f32
    %122 = vector.broadcast %cst : f32 to vector<2x16x16xf32>
    %123 = arith.subf %122, %121 : vector<2x16x16xf32>
    %124 = math.exp %123 : vector<2x16x16xf32>
    %cst_4 = arith.constant 1.000000e+00 : f32
    %125 = vector.broadcast %cst_4 : f32 to vector<2x16x16xf32>
    %126 = arith.addf %125, %124 : vector<2x16x16xf32>
    %127 = tpu.reciprocal %126 : vector<2x16x16xf32> -> vector<2x16x16xf32>
    %c0_5 = arith.constant 0 : index
    %128 = memref.load %arg3[%c0_5] : memref<3xf32, #tpu.memory_space<smem>>
    %129 = vector.broadcast %128 : f32 to vector<2x16x16xf32>
    %130 = arith.mulf %129, %127 : vector<2x16x16xf32>
    %c1_6 = arith.constant 1 : index
    %131 = memref.load %arg2[%c1_6] : memref<3xf32, #tpu.memory_space<smem>>
    %132 = vector.broadcast %131 : f32 to vector<2x16x16xf32>
    %133 = arith.addf %114, %132 : vector<2x16x16xf32>
    %cst_7 = arith.constant 0.000000e+00 : f32
    %134 = vector.broadcast %cst_7 : f32 to vector<2x16x16xf32>
    %135 = arith.subf %134, %133 : vector<2x16x16xf32>
    %136 = math.exp %135 : vector<2x16x16xf32>
    %cst_8 = arith.constant 1.000000e+00 : f32
    %137 = vector.broadcast %cst_8 : f32 to vector<2x16x16xf32>
    %138 = arith.addf %137, %136 : vector<2x16x16xf32>
    %139 = tpu.reciprocal %138 : vector<2x16x16xf32> -> vector<2x16x16xf32>
    %c1_9 = arith.constant 1 : index
    %140 = memref.load %arg3[%c1_9] : memref<3xf32, #tpu.memory_space<smem>>
    %141 = vector.broadcast %140 : f32 to vector<2x16x16xf32>
    %142 = arith.mulf %141, %139 : vector<2x16x16xf32>
    %143 = arith.addf %130, %142 : vector<2x16x16xf32>
    %c2_10 = arith.constant 2 : index
    %144 = memref.load %arg2[%c2_10] : memref<3xf32, #tpu.memory_space<smem>>
    %145 = vector.broadcast %144 : f32 to vector<2x16x16xf32>
    %146 = arith.addf %118, %145 : vector<2x16x16xf32>
    %cst_11 = arith.constant 0.000000e+00 : f32
    %147 = vector.broadcast %cst_11 : f32 to vector<2x16x16xf32>
    %148 = arith.subf %147, %146 : vector<2x16x16xf32>
    %149 = math.exp %148 : vector<2x16x16xf32>
    %cst_12 = arith.constant 1.000000e+00 : f32
    %150 = vector.broadcast %cst_12 : f32 to vector<2x16x16xf32>
    %151 = arith.addf %150, %149 : vector<2x16x16xf32>
    %152 = tpu.reciprocal %151 : vector<2x16x16xf32> -> vector<2x16x16xf32>
    %c2_13 = arith.constant 2 : index
    %153 = memref.load %arg3[%c2_13] : memref<3xf32, #tpu.memory_space<smem>>
    %154 = vector.broadcast %153 : f32 to vector<2x16x16xf32>
    %155 = arith.mulf %154, %152 : vector<2x16x16xf32>
    %156 = arith.addf %143, %155 : vector<2x16x16xf32>
    %c0_14 = arith.constant 0 : index
    %157 = memref.load %arg4[%c0_14] : memref<1xf32, #tpu.memory_space<smem>>
    %158 = vector.broadcast %157 : f32 to vector<2x16x16xf32>
    %159 = arith.addf %156, %158 : vector<2x16x16xf32>
    %cst_15 = arith.constant 0.000000e+00 : f32
    %160 = vector.broadcast %cst_15 : f32 to vector<2x16x16xf32>
    %161 = arith.subf %160, %159 : vector<2x16x16xf32>
    %162 = math.exp %161 : vector<2x16x16xf32>
    %cst_16 = arith.constant 1.000000e+00 : f32
    %163 = vector.broadcast %cst_16 : f32 to vector<2x16x16xf32>
    %164 = arith.addf %163, %162 : vector<2x16x16xf32>
    %165 = tpu.reciprocal %164 : vector<2x16x16xf32> -> vector<2x16x16xf32>
    %c0_17 = arith.constant 0 : index
    %c0_18 = arith.constant 0 : index
    %c0_19 = arith.constant 0 : index
    %166 = vector.load %arg6[%c0_17, %c0_18, %c0_19] : memref<2x16x16xf32, #tpu.memory_space<vmem>>, vector<2x16x16xf32>
    tpu.vector_store %arg6[%c0_17, %c0_18, %c0_19], %165 {strides = array<i32>} : memref<2x16x16xf32, #tpu.memory_space<vmem>>, vector<2x16x16xf32>,
    return
  }
  func.func @transform_0(%arg0: i32) -> i32 {
    %c0_i32 = arith.constant 0 : i32
    %c0_i32_0 = arith.constant 0 : i32
    return %c0_i32 : i32
  }
  func.func @transform_1(%arg0: i32) -> i32 {
    %c0_i32 = arith.constant 0 : i32
    %c0_i32_0 = arith.constant 0 : i32
    return %c0_i32 : i32
  }
  func.func @transform_2(%arg0: i32) -> i32 {
    %c0_i32 = arith.constant 0 : i32
    %c0_i32_0 = arith.constant 0 : i32
    return %c0_i32 : i32
  }
  func.func @transform_3(%arg0: i32) -> i32 {
    %c0_i32 = arith.constant 0 : i32
    %c0_i32_0 = arith.constant 0 : i32
    return %c0_i32 : i32
  }
  func.func @transform_4(%arg0: i32) -> (i32, i32, i32) {
    %c0_i32 = arith.constant 0 : i32
    %c0_i32_0 = arith.constant 0 : i32
    %c0_i32_1 = arith.constant 0 : i32
    return %arg0, %c0_i32, %c0_i32_0 : i32, i32, i32
  }
  func.func @transform_5(%arg0: i32) -> (i32, i32, i32) {
    %c0_i32 = arith.constant 0 : i32
    %c0_i32_0 = arith.constant 0 : i32
    %c0_i32_1 = arith.constant 0 : i32
    return %arg0, %c0_i32, %c0_i32_0 : i32, i32, i32
  }
}

</mosaic_0001>

<bundles_post_ra>
// kernel: tpu_custom_call.1
= control target key start
LH: loop header
LB: loop body
LE: loop exit
PB: predicated region body
PF: predicated region fallthrough
CT: control target
= control target key end

     0   :  { %11 = vsyncpa [#allocation6], 0  ;;  %s1846_s0 = inlined_call_operand.vmem [shape: f32[27], index: 0, kind: input, shape index: {}]   ;;  %s1847_s1 = inlined_call_operand.vmem [shape: f32[3], index: 1, kind: input, shape index: {}]   ;;  %s1848_s2 = inlined_call_operand.vmem [shape: f32[3], index: 2, kind: input, shape index: {}]   ;;  %s1849_s3 = inlined_call_operand.<no memory space> [shape: f32[1], index: 3, kind: input, shape index: {}]   ;;  %s1850_s4 = inlined_call_operand.hbm [shape: f32[2,16,16], index: 4, kind: input, shape index: {}]   ;;  %s1851_s5 = inlined_call_operand.hbm [shape: f32[2,16,16], index: 5, kind: output, shape index: {}]  }
   0x1   :  { %12 = vsyncpa [#allocation8], 0 }
   0x2   :  { %13 = vsyncpa [#allocation4], 0  ;;  %s31_s20 = sshll.u32 %s1847_s1, 4  ;;  %s32_s20 = int_to_ptr.vmem [resolvable:$true] %s31_s20 }
   0x3   :  { %14 = vsyncpa [#allocation5], 0  ;;  %s21_s23 = sshll.u32 %s1846_s0, 4  ;;  %s1245_s24 = scalar_lea.vmem %s32_s20, 16  ;;  %s22_s23 = int_to_ptr.vmem [resolvable:$true] %s21_s23 }
   0x4   :  { %p1246_p0 = scmp.ne.s32.totalorder %s32_s20, %s1245_s24  ;;  %p1250_p1 = scmp.lt.s32.totalorder %s32_s20, %s32_s20 }
   0x5   :  { %p1251_p2 = scmp.lt.s32.totalorder %s1245_s24, %s1245_s24 }
   0x7   :  { %p1252_p3 = por %p1251_p2, %p1250_p1 }
   0x9   :  { %p1253_p4 = pnand %p1252_p3, %p1246_p0 }
   0xb   :  { %1256 = shalt.err (!%p1253_p4)
}
   0xc   :  { %s1329_s25 = smov [#allocation7]   ;;  %s1257_s26 = scalar_lea.vmem %s22_s23, 16 }
   0xd   :  { %34 = dma.vmem_to_smem %s32_s20, 16, %s1329_s25, [#allocation8]  }
   0xe   :  { %p1258_p5 = scmp.ne.s32.totalorder %s22_s23, %s1257_s26  ;;  %p1262_p6 = scmp.lt.s32.totalorder %s22_s23, %s22_s23 }
   0xf   :  { %p1263_p7 = scmp.lt.s32.totalorder %s1257_s26, %s1257_s26 }
  0x11   :  { %p1264_p8 = por %p1263_p7, %p1262_p6 }
  0x13   :  { %p1265_p9 = pnand %p1264_p8, %p1258_p5 }
  0x15   :  { %1268 = shalt.err (!%p1265_p9)
}
  0x16   :  { %s1330_s1 = smov [#allocation3]   ;;  %s41_s28 = sshll.u32 %s1848_s2, 4  ;;  %s42_s28 = int_to_ptr.vmem [resolvable:$true] %s41_s28 }
  0x17   :  { %24 = dma.vmem_to_smem %s22_s23, 16, %s1330_s1, [#allocation6]  }
  0x18   :  { %s1269_s29 = scalar_lea.vmem %s42_s28, 16  ;;  %p1274_p11 = scmp.lt.s32.totalorder %s42_s28, %s42_s28 }
  0x19   :  { %p1270_p10 = scmp.ne.s32.totalorder %s42_s28, %s1269_s29  ;;  %p1275_p12 = scmp.lt.s32.totalorder %s1269_s29, %s1269_s29 }
  0x1b   :  { %p1276_p13 = por %p1275_p12, %p1274_p11 }
  0x1d   :  { %p1277_p0 = pnand %p1276_p13, %p1270_p10 }
  0x1f   :  { %1280 = shalt.err (!%p1277_p0)
}
  0x20   :  { %s1331_s30 = smov [#allocation9]   ;;  %s1332_s6 = smov [#allocation10]  }
  0x21   :  { %44 = dma.vmem_to_smem %s42_s28, 16, %s1331_s30, [#allocation8]  }
  0x22   :  { %s52_s7 = sshll.u32 %s1332_s6, 4  ;;  %s53_s7 = int_to_ptr.vmem [resolvable:$true] %s52_s7 }
  0x23   :  { %s1289_s8 = scalar_lea.vmem %s53_s7, 512  ;;  %p1294_p2 = scmp.lt.s32.totalorder %s53_s7, %s53_s7 }
  0x24   :  { %p1290_p1 = scmp.ne.s32.totalorder %s53_s7, %s1289_s8  ;;  %p1295_p3 = scmp.lt.s32.totalorder %s1289_s8, %s1289_s8 }
  0x26   :  { %p1296_p4 = por %p1295_p3, %p1294_p2 }
  0x28   :  { %p1297_p5 = pnand %p1296_p4, %p1290_p1 }
  0x2a   :  { %1300 = shalt.err (!%p1297_p5)
}
  0x2b   :  { %s1333_s2 = smov 128   ;;  %s1334_s9 = smov 8  }
  0x2c   :  { %58 = dma.hbm_to_vmem [thread:$0]  %s1850_s4, 512, %s53_s7, [#allocation4], %s1333_s2, %s1333_s2, %s1334_s9  }
  0x2d   :  { %1321 = dma.done.wait [#allocation6], 16  }
  0x2e   :  { %1322 = vsyncadd [#allocation6], 4294967280 }
  0x2f   :  { %1323 = dma.done.wait [#allocation8], 32  }
  0x30   :  { %1324 = vsyncadd [#allocation8], 4294967264 }
  0x31   :  { %1325 = dma.done.wait [#allocation4], 512  }
  0x32   :  { %1326 = vsyncadd [#allocation4], 4294966784 }
  0x33   :  { %71 = sfence }
  0x34   :  { %v74_v0 = vld [vmem:[#allocation10 + $0x10] sm:$0xff]  ;;  %v75_v1 = vld [vmem:[#allocation10 + $0x18] sm:$0xff]  ;;  %vm84_vm0 = vcmask 1041408   ;;  %v72_v2 = vld [vmem:[#allocation10] sm:$0xff]  ;;  %s1335_s12 = smov 114   ;;  %s1336_s4 = smov 2  }
  0x35   :  { %v79_v3 = vrot.slane %v75_v1, 6  ;;  %v87_v4 = vrot.slane %v74_v0, 6  ;;  %v73_v5 = vld [vmem:[#allocation10 + $0x8] sm:$0xff]  ;;  %v85_v6 = vrot.slane %v72_v2, 6  ;;  %s1142_s13 = sld [smem:[#allocation3 + $0x1]]  ;;  %vm131_vm1 = vcmask 15360  }
  0x36   :  { %v78_v7 = vrot.slane %v73_v5, 6  ;;  %s1143_s14 = sld [smem:[#allocation3 + $0xa]]  ;;  %s1337_s15 = smov 127   ;;  %vm326_vm2 = vcmask 1046528   ;;  %vm663_vm3 = vcmask 1045504   ;;  %vm1116_vm4 = vcmask 130048  }
  0x37   :  { %v92_v8 = vsel %vm84_vm0, %v79_v3, %v87_v4  ;;  %v88_v10 = vsel %vm84_vm0, %v87_v4, %v79_v3  ;;  %s1144_s16 = sld [smem:[#allocation3 + $0x13]]  ;;  %s1338_s19 = smov 126  }
  0x38   :  { %101 = vrot.lane.b32.xlu1 %v92_v8, %s1335_s12  ;;  %v91_v9 = vsel %vm84_vm0, %v78_v7, %v85_v6  ;;  %v86_v11 = vsel %vm84_vm0, %v85_v6, %v78_v7  ;;  %s1145_s17 = sld [smem:[#allocation3 + $0x2]] }
  0x39   :  { %95 = vrot.lane.b32.xlu0 %v91_v9, %s1335_s12  ;;  %s1146_s18 = sld [smem:[#allocation3 + $0xb]] }
  0x3a   :  { %s1147_s20 = sld [smem:[#allocation3 + $0x14]] }
  0x3b   :  { %v157_v16 = vstv %s1142_s13  ;;  %s1151_s21 = sld [smem:[#allocation3 + $0x4]] }
  0x3c   :  { %103 = vrot.lane.b32.xlu1 %v88_v10, %s1335_s12  ;;  %v183_v29 = vstv %s1143_s14  ;;  %s1152_s22 = sld [smem:[#allocation3 + $0xd]] }
  0x3d   :  { %97 = vrot.lane.b32.xlu0 %v86_v11, %s1335_s12  ;;  %v209_v34 = vstv %s1144_s16  ;;  %s1153_s23 = sld [smem:[#allocation3 + $0x16]] }
  0x3e   :  { %v235_v39 = vstv %s1145_s17  ;;  %s1154_s24 = sld [smem:[#allocation3 + $0x5]] }
  0x3f   :  { %v261_v45 = vstv %s1146_s18  ;;  %s1155_s25 = sld [smem:[#allocation3 + $0xe]] }
  0x40   :  { %115 = vrot.lane.b32.xlu1 %v86_v11, %s1336_s4  ;;  %v287_v52 = vstv %s1147_s20  ;;  %s1156_s26 = sld [smem:[#allocation3 + $0x17]] }
  0x41   :  { %113 = vrot.lane.b32.xlu0 %v91_v9, %s1336_s4  ;;  %v410_v55 = vstv %s1151_s21  ;;  %s1160_s1 = sld [smem:[#allocation3 + $0x7]] }
  0x42   :  { %v450_v2 = vstv %s1152_s22  ;;  %s1161_s0 = sld [smem:[#allocation3 + $0x10]] }
  0x43   :  { %s1162_s27 = sld [smem:[#allocation3 + $0x19]] }
  0x44   :  { %121 = vrot.lane.b32.xlu1 %v88_v10, %s1336_s4  ;;  %s1163_s28 = sld [smem:[#allocation3 + $0x8]] }
  0x45   :  { %119 = vrot.lane.b32.xlu0 %v92_v8, %s1336_s4  ;;  %s1164_s29 = sld [smem:[#allocation3 + $0x11]] }
  0x46   :  { %s1165_s30 = sld [smem:[#allocation3 + $0x1a]] }
  0x47   :  { %s1598_s6 = sld [smem:[#allocation3 + $0x3]] }
  0x48   :  { %105 = vrot.lane.b32.xlu1 %v79_v3, %s1335_s12  ;;  %s1600_s7 = sld [smem:[#allocation3]] }
  0x49   :  { %99 = vrot.lane.b32.xlu0 %v78_v7, %s1335_s12  ;;  %s1604_s8 = sld [smem:[#allocation3 + $0x9]] }
  0x4a   :  { %s1612_s10 = sld [smem:[#allocation3 + $0x12]] }
  0x4b   :  { %s1617_s11 = sld [smem:[#allocation3 + $0xc]] }
  0x4c   :  { %123 = vrot.lane.b32.xlu1 %v79_v3, %s1336_s4  ;;  %s1631_s12 = sld [smem:[#allocation3 + $0x15]] }
  0x4d   :  { %117 = vrot.lane.b32.xlu0 %v78_v7, %s1336_s4  ;;  %s1157_s4 = sld [smem:[#allocation3 + $0x6]] }
  0x4e   :  { %s1158_s13 = sld [smem:[#allocation3 + $0xf]] }
  0x4f   :  { %s1159_s14 = sld [smem:[#allocation3 + $0x18]] }
  0x50   :  { %s1166_s16 = sld [smem:[#allocation7 + $0x1]] }
  0x51   :  { %s1168_s17 = sld [smem:[#allocation7 + $0x2]] }
  0x52   :  { %s1012_s18 = sld [smem:[#allocation9]] }
  0x53   :  { %s1169_s20 = sld [smem:[#allocation9 + $0x2]] }
  0xaa   :  { %v102_v12 = vpop.permute.xlu1 %101 }
  0xab   :  { %v96_v13 = vpop.permute.xlu0 %95 }
  0xae   :  { %v104_v14 = vpop.permute.xlu1 %103 }
  0xaf   :  { %v98_v15 = vpop.permute.xlu0 %97 }
  0xb2   :  { %v116_v17 = vpop.permute.xlu1 %115 }
  0xb3   :  { %v1386_v18 = vsel %vm131_vm1, %v98_v15, %v116_v17  ;;  %v114_v19 = vpop.permute.xlu0 %113  ;;  %v490_v15 = vstv %s1153_s23 }
  0xb4   :  { %v1389_v20 = vsel %vm131_vm1, %v96_v13, %v114_v19  ;;  %v159_v21 = vmul.f32 %v157_v16, %v1386_v18  ;;  %v185_v30 = vmul.f32 %v183_v29, %v1386_v18  ;;  %v211_v35 = vmul.f32 %v209_v34, %v1386_v18 }
  0xb5   :  { %v158_v22 = vmul.f32 %v157_v16, %v1389_v20  ;;  %v184_v31 = vmul.f32 %v183_v29, %v1389_v20  ;;  %v210_v36 = vmul.f32 %v209_v34, %v1389_v20  ;;  %v237_v40 = vmul.f32 %v235_v39, %v1386_v18 }
  0xb6   :  { %v122_v23 = vpop.permute.xlu1 %121  ;;  %168 = vrot.lane.b32.xlu1 %v159_v21, %s1337_s15  ;;  %v236_v41 = vmul.f32 %v235_v39, %v1389_v20  ;;  %v263_v46 = vmul.f32 %v261_v45, %v1386_v18  ;;  %v262_v48 = vmul.f32 %v261_v45, %v1389_v20  ;;  %v289_v56 = vmul.f32 %v287_v52, %v1386_v18 }
  0xb7   :  { %v1395_v24 = vsel %vm131_vm1, %v104_v14, %v122_v23  ;;  %166 = vrot.lane.b32.xlu0 %v158_v22, %s1337_s15  ;;  %v120_v25 = vpop.permute.xlu0 %119  ;;  %v288_v57 = vmul.f32 %v287_v52, %v1389_v20  ;;  %v411_v60 = vmul.f32 %v410_v55, %v1389_v20  ;;  %v412_v61 = vmul.f32 %v410_v55, %v1386_v18 }
  0xb8   :  { %v1399_v26 = vsel %vm131_vm1, %v102_v12, %v120_v25  ;;  %v161_v27 = vmul.f32 %v157_v16, %v1395_v24  ;;  %v187_v32 = vmul.f32 %v183_v29, %v1395_v24  ;;  %v213_v37 = vmul.f32 %v209_v34, %v1395_v24 }
  0xb9   :  { %v160_v28 = vmul.f32 %v157_v16, %v1399_v26  ;;  %v186_v33 = vmul.f32 %v183_v29, %v1399_v26  ;;  %v212_v38 = vmul.f32 %v209_v34, %v1399_v26  ;;  %v239_v42 = vmul.f32 %v235_v39, %v1395_v24 }
  0xba   :  { %172 = vrot.lane.b32.xlu1 %v161_v27, %s1337_s15  ;;  %v238_v44 = vmul.f32 %v235_v39, %v1399_v26  ;;  %v106_v47 = vpop.permute.xlu1 %105  ;;  %v265_v50 = vmul.f32 %v261_v45, %v1395_v24  ;;  %v264_v51 = vmul.f32 %v261_v45, %v1399_v26  ;;  %v291_v62 = vmul.f32 %v287_v52, %v1395_v24 }
  0xbb   :  { %170 = vrot.lane.b32.xlu0 %v160_v28, %s1337_s15  ;;  %v100_v43 = vpop.permute.xlu0 %99  ;;  %v290_v63 = vmul.f32 %v287_v52, %v1399_v26  ;;  %v423_v3 = vrot.slane %v411_v60, 1  ;;  %v424_v4 = vrot.slane %v412_v61, 1  ;;  %v414_v5 = vmul.f32 %v410_v55, %v1399_v26 }
  0xbc   :  { %v415_v6 = vmul.f32 %v410_v55, %v1395_v24  ;;  %v451_v9 = vmul.f32 %v450_v2, %v1389_v20  ;;  %v452_v14 = vmul.f32 %v450_v2, %v1386_v18  ;;  %v454_v19 = vmul.f32 %v450_v2, %v1399_v26 }
  0xbd   :  { %v425_v11 = vsel %vm326_vm2, %v423_v3, %v424_v4  ;;  %v428_v12 = vrot.slane %v414_v5, 1  ;;  %v455_v27 = vmul.f32 %v450_v2, %v1395_v24  ;;  %v491_v28 = vmul.f32 %v490_v15, %v1389_v20 }
  0xbe   :  { %194 = vrot.lane.b32.xlu1 %v185_v30, %s1337_s15  ;;  %v124_v54 = vpop.permute.xlu1 %123  ;;  %v429_v13 = vrot.slane %v415_v6, 1  ;;  %v463_v23 = vrot.slane %v451_v9, 1  ;;  %v464_v25 = vrot.slane %v452_v14, 1  ;;  %v468_v34 = vrot.slane %v454_v19, 1 }
  0xbf   :  { %192 = vrot.lane.b32.xlu0 %v184_v31, %s1337_s15  ;;  %v118_v49 = vpop.permute.xlu0 %117  ;;  %v1444_v59 = vsel %vm131_vm1, %v106_v47, %v124_v54  ;;  %v492_v31 = vmul.f32 %v490_v15, %v1386_v18 }
  0xc0   :  { %v1436_v53 = vsel %vm131_vm1, %v100_v43, %v118_v49  ;;  %v416_v1 = vmul.f32 %v410_v55, %v1444_v59  ;;  %v456_v21 = vmul.f32 %v450_v2, %v1444_v59  ;;  %v430_v22 = vsel %vm326_vm2, %v428_v12, %v429_v13 }
  0xc1   :  { %v413_v58 = vmul.f32 %v410_v55, %v1436_v53  ;;  %v453_v10 = vmul.f32 %v450_v2, %v1436_v53  ;;  %v495_v43 = vmul.f32 %v490_v15, %v1395_v24 }
  0xc2   :  { %198 = vrot.lane.b32.xlu1 %v187_v32, %s1337_s15  ;;  %v431_v8 = vrot.slane %v416_v1, 1  ;;  %v471_v30 = vrot.slane %v456_v21, 1  ;;  %v493_v32 = vmul.f32 %v490_v15, %v1436_v53 }
  0xc3   :  { %196 = vrot.lane.b32.xlu0 %v186_v33, %s1337_s15  ;;  %v426_v0 = vrot.slane %v413_v58, 1  ;;  %v466_v17 = vrot.slane %v453_v10, 1  ;;  %v465_v33 = vsel %vm326_vm2, %v463_v23, %v464_v25 }
  0xc4   :  { %v432_v16 = vsel %vm326_vm2, %v429_v13, %v431_v8  ;;  %v506_v39 = vrot.slane %v493_v32, 1  ;;  %v610_v8 = vstv %s1156_s26 }
  0xc5   :  { %v427_v7 = vsel %vm326_vm2, %v424_v4, %v426_v0  ;;  %v467_v29 = vsel %vm326_vm2, %v464_v25, %v466_v17  ;;  %v611_v17 = vmul.f32 %v610_v8, %v1389_v20  ;;  %v613_v23 = vmul.f32 %v610_v8, %v1436_v53 }
  0xc6   :  { %220 = vrot.lane.b32.xlu1 %v211_v35, %s1337_s15  ;;  %v469_v35 = vrot.slane %v455_v27, 1 }
  0xc7   :  { %218 = vrot.lane.b32.xlu0 %v210_v36, %s1337_s15  ;;  %v503_v36 = vrot.slane %v491_v28, 1  ;;  %v626_v32 = vrot.slane %v613_v23, 1 }
  0xca   :  { %224 = vrot.lane.b32.xlu1 %v213_v37, %s1337_s15  ;;  %v472_v37 = vsel %vm326_vm2, %v469_v35, %v471_v30 }
  0xcb   :  { %222 = vrot.lane.b32.xlu0 %v212_v38, %s1337_s15  ;;  %v504_v38 = vrot.slane %v492_v31, 1 }
  0xcd   :  { %v505_v45 = vsel %vm326_vm2, %v503_v36, %v504_v38  ;;  %v615_v36 = vmul.f32 %v610_v8, %v1395_v24 }
  0xce   :  { %246 = vrot.lane.b32.xlu1 %v237_v40, %s1338_s19  ;;  %v496_v40 = vmul.f32 %v490_v15, %v1444_v59 }
  0xcf   :  { %244 = vrot.lane.b32.xlu0 %v236_v41, %s1338_s19  ;;  %v470_v41 = vsel %vm326_vm2, %v468_v34, %v469_v35  ;;  %v614_v35 = vmul.f32 %v610_v8, %v1399_v26 }
  0xd0   :  { %v511_v47 = vrot.slane %v496_v40, 1 }
  0xd2   :  { %250 = vrot.lane.b32.xlu1 %v239_v42, %s1338_s19  ;;  %v494_v42 = vmul.f32 %v490_v15, %v1399_v26 }
  0xd3   :  { %248 = vrot.lane.b32.xlu0 %v238_v44, %s1338_s19  ;;  %v530_v44 = vstv %s1154_s24 }
  0xd4   :  { %v508_v49 = vrot.slane %v494_v42, 1  ;;  %v532_v52 = vmul.f32 %v530_v44, %v1386_v18  ;;  %v534_v54 = vmul.f32 %v530_v44, %v1399_v26  ;;  %v536_v58 = vmul.f32 %v530_v44, %v1444_v59 }
  0xd5   :  { %v628_v42 = vrot.slane %v614_v35, 1 }
  0xd6   :  { %272 = vrot.lane.b32.xlu1 %v263_v46, %s1338_s19  ;;  %v507_v46 = vsel %vm326_vm2, %v504_v38, %v506_v39  ;;  %v548_v0 = vrot.slane %v534_v54, 1  ;;  %v551_v3 = vrot.slane %v536_v58, 1 }
  0xd7   :  { %270 = vrot.lane.b32.xlu0 %v262_v48, %s1338_s19  ;;  %v533_v48 = vmul.f32 %v530_v44, %v1436_v53 }
  0xda   :  { %276 = vrot.lane.b32.xlu1 %v265_v50, %s1338_s19  ;;  %v509_v50 = vrot.slane %v495_v43, 1  ;;  %v629_v43 = vrot.slane %v615_v36, 1 }
  0xdb   :  { %274 = vrot.lane.b32.xlu0 %v264_v51, %s1338_s19  ;;  %v531_v51 = vmul.f32 %v530_v44, %v1389_v20 }
  0xdc   :  { %v512_v55 = vsel %vm326_vm2, %v509_v50, %v511_v47  ;;  %v510_v60 = vsel %vm326_vm2, %v508_v49, %v509_v50  ;;  %v630_v50 = vsel %vm326_vm2, %v628_v42, %v629_v43 }
  0xdd   :  { %v543_v61 = vrot.slane %v531_v51, 1 }
  0xde   :  { %298 = vrot.lane.b32.xlu1 %v289_v56, %s1338_s19  ;;  %v546_v56 = vrot.slane %v533_v48, 1 }
  0xdf   :  { %296 = vrot.lane.b32.xlu0 %v288_v57, %s1338_s19  ;;  %v535_v57 = vmul.f32 %v530_v44, %v1395_v24 }
  0xe1   :  { %v549_v2 = vrot.slane %v535_v57, 1 }
  0xe2   :  { %302 = vrot.lane.b32.xlu1 %v291_v62, %s1338_s19  ;;  %v544_v62 = vrot.slane %v532_v52, 1 }
  0xe3   :  { %300 = vrot.lane.b32.xlu0 %v290_v63, %s1338_s19  ;;  %v570_v63 = vstv %s1155_s25  ;;  %v550_v9 = vsel %vm326_vm2, %v548_v0, %v549_v2  ;;  %v552_v10 = vsel %vm326_vm2, %v549_v2, %v551_v3 }
  0xe4   :  { %v547_v1 = vsel %vm326_vm2, %v544_v62, %v546_v56  ;;  %v573_v4 = vmul.f32 %v570_v63, %v1436_v53  ;;  %v545_v5 = vsel %vm326_vm2, %v543_v61, %v544_v62  ;;  %v571_v6 = vmul.f32 %v570_v63, %v1389_v20 }
  0xe5   :  { %v576_v12 = vmul.f32 %v570_v63, %v1444_v59  ;;  %v574_v15 = vmul.f32 %v570_v63, %v1399_v26 }
  0xe6   :  { %435 = vrot.lane.b32.xlu1 %v427_v7, %s1337_s15  ;;  %v572_v7 = vmul.f32 %v570_v63, %v1386_v18  ;;  %v583_v13 = vrot.slane %v571_v6, 1 }
  0xe7   :  { %433 = vrot.lane.b32.xlu0 %v425_v11, %s1337_s15  ;;  %v586_v11 = vrot.slane %v573_v4, 1  ;;  %v591_v21 = vrot.slane %v576_v12, 1  ;;  %v588_v27 = vrot.slane %v574_v15, 1 }
  0xe8   :  { %v584_v14 = vrot.slane %v572_v7, 1 }
  0xea   :  { %439 = vrot.lane.b32.xlu1 %v432_v16, %s1337_s15  ;;  %v575_v16 = vmul.f32 %v570_v63, %v1395_v24  ;;  %v587_v19 = vsel %vm326_vm2, %v584_v14, %v586_v11  ;;  %v585_v25 = vsel %vm326_vm2, %v583_v13, %v584_v14 }
  0xeb   :  { %437 = vrot.lane.b32.xlu0 %v430_v22, %s1337_s15  ;;  %v612_v22 = vmul.f32 %v610_v8, %v1386_v18 }
  0xec   :  { %v589_v28 = vrot.slane %v575_v16, 1 }
  0xed   :  { %v624_v31 = vrot.slane %v612_v22, 1 }
  0xee   :  { %475 = vrot.lane.b32.xlu1 %v467_v29, %s1337_s15  ;;  %v623_v29 = vrot.slane %v611_v17, 1  ;;  %v592_v30 = vsel %vm326_vm2, %v589_v28, %v591_v21  ;;  %v590_v34 = vsel %vm326_vm2, %v588_v27, %v589_v28 }
  0xef   :  { %473 = vrot.lane.b32.xlu0 %v465_v33, %s1337_s15  ;;  %v616_v33 = vmul.f32 %v610_v8, %v1444_v59  ;;  %v627_v39 = vsel %vm326_vm2, %v624_v31, %v626_v32 }
  0xf0   :  { %v625_v38 = vsel %vm326_vm2, %v623_v29, %v624_v31 }
  0xf1   :  { %v631_v40 = vrot.slane %v616_v33, 1 }
  0xf2   :  { %479 = vrot.lane.b32.xlu1 %v472_v37, %s1337_s15  ;;  %v747_v37 = vstv %s1160_s1 }
  0xf3   :  { %477 = vrot.lane.b32.xlu0 %v470_v41, %s1337_s15  ;;  %v750_v41 = vmul.f32 %v747_v37, %v1436_v53  ;;  %v748_v44 = vmul.f32 %v747_v37, %v1389_v20  ;;  %v751_v48 = vmul.f32 %v747_v37, %v1399_v26  ;;  %v753_v49 = vmul.f32 %v747_v37, %v1444_v59 }
  0xf4   :  { %v752_v54 = vmul.f32 %v747_v37, %v1395_v24 }
  0xf5   :  { %v763_v47 = vrot.slane %v750_v41, 2  ;;  %v760_v51 = vrot.slane %v748_v44, 2  ;;  %v765_v57 = vrot.slane %v751_v48, 2  ;;  %v768_v58 = vrot.slane %v753_v49, 2 }
  0xf6   :  { %515 = vrot.lane.b32.xlu1 %v507_v46, %s1337_s15  ;;  %v632_v46 = vsel %vm326_vm2, %v629_v43, %v631_v40  ;;  %v766_v62 = vrot.slane %v752_v54, 2  ;;  %v907_v40 = vstv %s1164_s29 }
  0xf7   :  { %513 = vrot.lane.b32.xlu0 %v505_v45, %s1337_s15  ;;  %v749_v45 = vmul.f32 %v747_v37, %v1386_v18 }
  0xf9   :  { %v761_v52 = vrot.slane %v749_v45, 2 }
  0xfa   :  { %519 = vrot.lane.b32.xlu1 %v512_v55, %s1337_s15  ;;  %v787_v55 = vstv %s1161_s0 }
  0xfb   :  { %517 = vrot.lane.b32.xlu0 %v510_v60, %s1337_s15  ;;  %v764_v56 = vsel %vm663_vm3, %v761_v52, %v763_v47  ;;  %v790_v60 = vmul.f32 %v787_v55, %v1436_v53  ;;  %v762_v61 = vsel %vm663_vm3, %v760_v51, %v761_v52  ;;  %v788_v63 = vmul.f32 %v787_v55, %v1389_v20 }
  0xfc   :  { %v789_v0 = vmul.f32 %v787_v55, %v1386_v18  ;;  %v791_v3 = vmul.f32 %v787_v55, %v1399_v26  ;;  %v793_v4 = vmul.f32 %v787_v55, %v1444_v59  ;;  %v792_v8 = vmul.f32 %v787_v55, %v1395_v24 }
  0xfd   :  { %v803_v2 = vrot.slane %v790_v60, 2  ;;  %v800_v6 = vrot.slane %v788_v63, 2  ;;  %v908_v55 = vmul.f32 %v907_v40, %v1389_v20  ;;  %v947_v63 = vstv %s1165_s30 }
  0xfe   :  { %555 = vrot.lane.b32.xlu1 %v547_v1, %s1338_s19  ;;  %v769_v1 = vsel %vm663_vm3, %v766_v62, %v768_v58  ;;  %v801_v7 = vrot.slane %v789_v0, 2  ;;  %v805_v12 = vrot.slane %v791_v3, 2  ;;  %v808_v13 = vrot.slane %v793_v4, 2 }
  0xff   :  { %553 = vrot.lane.b32.xlu0 %v545_v5, %s1338_s19  ;;  %v767_v5 = vsel %vm663_vm3, %v765_v57, %v766_v62  ;;  %v806_v15 = vrot.slane %v792_v8, 2  ;;  %v913_v4 = vmul.f32 %v907_v40, %v1444_v59  ;;  %v912_v8 = vmul.f32 %v907_v40, %v1395_v24 }
 0x100   :  { %v804_v11 = vsel %vm663_vm3, %v801_v7, %v803_v2  ;;  %v802_v14 = vsel %vm663_vm3, %v800_v6, %v801_v7  ;;  %v920_v2 = vrot.slane %v908_v55, 2  ;;  %v911_v7 = vmul.f32 %v907_v40, %v1399_v26 }
 0x101   :  { %v809_v21 = vsel %vm663_vm3, %v806_v15, %v808_v13  ;;  %v807_v27 = vsel %vm663_vm3, %v805_v12, %v806_v15  ;;  %v928_v12 = vrot.slane %v913_v4, 2  ;;  %v948_v13 = vmul.f32 %v947_v63, %v1389_v20 }
 0x102   :  { %559 = vrot.lane.b32.xlu1 %v552_v10, %s1338_s19 }
 0x103   :  { %557 = vrot.lane.b32.xlu0 %v550_v9, %s1338_s19  ;;  %v827_v9 = vstv %s1162_s27 }
 0x104   :  { %v830_v10 = vmul.f32 %v827_v9, %v1436_v53  ;;  %v828_v16 = vmul.f32 %v827_v9, %v1389_v20  ;;  %v829_v17 = vmul.f32 %v827_v9, %v1386_v18  ;;  %v831_v22 = vmul.f32 %v827_v9, %v1399_v26 }
 0x105   :  { %v832_v23 = vmul.f32 %v827_v9, %v1395_v24 }
 0x106   :  { %595 = vrot.lane.b32.xlu1 %v587_v19, %s1338_s19  ;;  %v843_v19 = vrot.slane %v830_v10, 2  ;;  %v840_v28 = vrot.slane %v828_v16, 2  ;;  %v841_v29 = vrot.slane %v829_v17, 2  ;;  %v845_v32 = vrot.slane %v831_v22, 2 }
 0x107   :  { %593 = vrot.lane.b32.xlu0 %v585_v25, %s1338_s19  ;;  %v833_v25 = vmul.f32 %v827_v9, %v1444_v59  ;;  %v846_v33 = vrot.slane %v832_v23, 2  ;;  %v925_v16 = vrot.slane %v911_v7, 2  ;;  %v926_v17 = vrot.slane %v912_v8, 2 }
 0x108   :  { %v844_v31 = vsel %vm663_vm3, %v841_v29, %v843_v19  ;;  %v842_v36 = vsel %vm663_vm3, %v840_v28, %v841_v29  ;;  %v949_v19 = vmul.f32 %v947_v63, %v1386_v18  ;;  %v139_v22 = vstv %s1600_s7 }
 0x109   :  { %v847_v42 = vsel %vm663_vm3, %v845_v32, %v846_v33  ;;  %v953_v28 = vmul.f32 %v947_v63, %v1444_v59  ;;  %v142_v4 = vmul.f32 %v139_v22, %v1399_v26 }
 0x10a   :  { %599 = vrot.lane.b32.xlu1 %v592_v30, %s1338_s19  ;;  %v867_v30 = vstv %s1163_s28 }
 0x10b   :  { %597 = vrot.lane.b32.xlu0 %v590_v34, %s1338_s19  ;;  %v848_v34 = vrot.slane %v833_v25, 2  ;;  %v870_v35 = vmul.f32 %v867_v30, %v1436_v53  ;;  %v868_v37 = vmul.f32 %v867_v30, %v1389_v20  ;;  %v873_v45 = vmul.f32 %v867_v30, %v1444_v59 }
 0x10c   :  { %v871_v48 = vmul.f32 %v867_v30, %v1399_v26  ;;  %v872_v49 = vmul.f32 %v867_v30, %v1395_v24  ;;  %v951_v25 = vmul.f32 %v947_v63, %v1399_v26 }
 0x10d   :  { %v849_v43 = vsel %vm663_vm3, %v846_v33, %v848_v34  ;;  %v883_v44 = vrot.slane %v870_v35, 2  ;;  %v888_v54 = vrot.slane %v873_v45, 2  ;;  %v927_v34 = vsel %vm663_vm3, %v925_v16, %v926_v17 }
 0x10e   :  { %635 = vrot.lane.b32.xlu1 %v627_v39, %s1338_s19  ;;  %v885_v58 = vrot.slane %v871_v48, 2  ;;  %v886_v60 = vrot.slane %v872_v49, 2  ;;  %v961_v35 = vrot.slane %v949_v19, 2  ;;  %v965_v45 = vrot.slane %v951_v25, 2 }
 0x10f   :  { %633 = vrot.lane.b32.xlu0 %v625_v38, %s1338_s19  ;;  %v869_v38 = vmul.f32 %v867_v30, %v1386_v18  ;;  %v929_v30 = vsel %vm663_vm3, %v926_v17, %v928_v12  ;;  %v140_v48 = vmul.f32 %v139_v22, %v1389_v20 }
 0x111   :  { %v881_v47 = vrot.slane %v869_v38, 2  ;;  %v1648_v38 = vstv %s1604_s8 }
 0x112   :  { %639 = vrot.lane.b32.xlu1 %v632_v46, %s1338_s19  ;;  %v880_v46 = vrot.slane %v868_v37, 2 }
 0x113   :  { %637 = vrot.lane.b32.xlu0 %v630_v50, %s1338_s19  ;;  %v884_v52 = vsel %vm663_vm3, %v881_v47, %v883_v44 }
 0x114   :  { %v882_v57 = vsel %vm663_vm3, %v880_v46, %v881_v47  ;;  %v968_v47 = vrot.slane %v953_v28, 2  ;;  %v146_v28 = vmul.f32 %v1648_v38, %v1389_v20 }
 0x116   :  { %772 = vrot.lane.b32.xlu1 %v764_v56, %s1337_s15  ;;  %v910_v56 = vmul.f32 %v907_v40, %v1436_v53 }
 0x117   :  { %770 = vrot.lane.b32.xlu0 %v762_v61, %s1337_s15  ;;  %v909_v61 = vmul.f32 %v907_v40, %v1386_v18  ;;  %v1651_v40 = vstv %s1612_s10 }
 0x118   :  { %v923_v3 = vrot.slane %v910_v56, 2 }
 0x119   :  { %v921_v6 = vrot.slane %v909_v61, 2 }
 0x11a   :  { %776 = vrot.lane.b32.xlu1 %v769_v1, %s1337_s15  ;;  %v889_v1 = vsel %vm663_vm3, %v886_v60, %v888_v54 }
 0x11b   :  { %774 = vrot.lane.b32.xlu0 %v767_v5, %s1337_s15  ;;  %v887_v5 = vsel %vm663_vm3, %v885_v58, %v886_v60  ;;  %v922_v15 = vsel %vm663_vm3, %v920_v2, %v921_v6  ;;  %v1671_v2 = vstv %s1631_s12 }
 0x11e   :  { %812 = vrot.lane.b32.xlu1 %v804_v11, %s1337_s15  ;;  %v924_v11 = vsel %vm663_vm3, %v921_v6, %v923_v3 }
 0x11f   :  { %810 = vrot.lane.b32.xlu0 %v802_v14, %s1337_s15  ;;  %v950_v14 = vmul.f32 %v947_v63, %v1436_v53 }
 0x121   :  { %v963_v32 = vrot.slane %v950_v14, 2 }
 0x122   :  { %816 = vrot.lane.b32.xlu1 %v809_v21, %s1337_s15  ;;  %v313_v21 = vstv %s1598_s6 }
 0x123   :  { %814 = vrot.lane.b32.xlu0 %v807_v27, %s1337_s15  ;;  %v952_v27 = vmul.f32 %v947_v63, %v1395_v24  ;;  %v316_v33 = vmul.f32 %v313_v21, %v1436_v53  ;;  %v314_v37 = vmul.f32 %v313_v21, %v1389_v20  ;;  %v318_v55 = vmul.f32 %v313_v21, %v1395_v24 }
 0x124   :  { %v319_v60 = vmul.f32 %v313_v21, %v1444_v59  ;;  %v143_v63 = vmul.f32 %v139_v22, %v1395_v24 }
 0x125   :  { %v966_v46 = vrot.slane %v952_v27, 2  ;;  %v330_v54 = vrot.slane %v316_v33, 1  ;;  %v327_v58 = vrot.slane %v314_v37, 1  ;;  %v333_v12 = vrot.slane %v318_v55, 1 }
 0x126   :  { %852 = vrot.lane.b32.xlu1 %v844_v31, %s1337_s15  ;;  %v960_v31 = vrot.slane %v948_v13, 2  ;;  %v147_v27 = vmul.f32 %v1648_v38, %v1386_v18  ;;  %v148_v55 = vmul.f32 %v1648_v38, %v1399_v26 }
 0x127   :  { %850 = vrot.lane.b32.xlu0 %v842_v36, %s1337_s15  ;;  %v315_v36 = vmul.f32 %v313_v21, %v1386_v18  ;;  %v967_v6 = vsel %vm663_vm3, %v965_v45, %v966_v46  ;;  %v969_v7 = vsel %vm663_vm3, %v966_v46, %v968_v47 }
 0x128   :  { %v1576_v39 = vpop.permute.xlu1 %168  ;;  %v962_v56 = vsel %vm663_vm3, %v960_v31, %v961_v35 }
 0x129   :  { %v1578_v41 = vpop.permute.xlu0 %166 }
 0x12a   :  { %856 = vrot.lane.b32.xlu1 %v849_v43, %s1337_s15  ;;  %v141_v43 = vmul.f32 %v139_v22, %v1386_v18  ;;  %v178_v3 = vadd.f32 %v1578_v41, %v140_v48  ;;  %v335_v41 = vrot.slane %v319_v60, 1 }
 0x12b   :  { %854 = vrot.lane.b32.xlu0 %v847_v42, %s1337_s15  ;;  %v346_v42 = vstv %s1617_s11  ;;  %s986_s15 = sld [smem:[#allocation7]] }
 0x12c   :  { %v1587_v50 = vpop.permute.xlu1 %172  ;;  %v179_v61 = vadd.f32 %v1576_v39, %v141_v43  ;;  %v348_v13 = vmul.f32 %v346_v42, %v1386_v18  ;;  %v349_v16 = vmul.f32 %v346_v42, %v1436_v53  ;;  %v347_v22 = vmul.f32 %v346_v42, %v1389_v20 }
 0x12d   :  { %v1589_v51 = vpop.permute.xlu0 %170  ;;  %v181_v17 = vadd.f32 %v1587_v50, %v143_v63  ;;  %v336_v37 = vsel %vm326_vm2, %v333_v12, %v335_v41  ;;  %v350_v43 = vmul.f32 %v346_v42, %v1399_v26  ;;  %v383_v41 = vmul.f32 %v1671_v2, %v1395_v24 }
 0x12e   :  { %892 = vrot.lane.b32.xlu1 %v884_v52, %s1338_s19  ;;  %v964_v52 = vsel %vm663_vm3, %v961_v35, %v963_v32  ;;  %v180_v25 = vadd.f32 %v1589_v51, %v142_v4  ;;  %v360_v33 = vrot.slane %v348_v13, 1  ;;  %v352_v35 = vmul.f32 %v346_v42, %v1444_v59 }
 0x12f   :  { %890 = vrot.lane.b32.xlu0 %v882_v57, %s1338_s19  ;;  %v328_v57 = vrot.slane %v315_v36, 1  ;;  %v362_v51 = vrot.slane %v349_v16, 1  ;;  %v359_v48 = vrot.slane %v347_v22, 1 }
 0x130   :  { %v1602_v62 = vpop.permute.xlu1 %194 }
 0x131   :  { %v1606_v0 = vpop.permute.xlu0 %192  ;;  %v331_v39 = vsel %vm326_vm2, %v328_v57, %v330_v54  ;;  %v205_v45 = vadd.f32 %v1602_v62, %v147_v27  ;;  %v149_v54 = vmul.f32 %v1648_v38, %v1395_v24  ;;  %v367_v62 = vrot.slane %v352_v35, 1 }
 0x132   :  { %896 = vrot.lane.b32.xlu1 %v889_v1, %s1338_s19  ;;  %v317_v1 = vmul.f32 %v313_v21, %v1399_v26 }
 0x133   :  { %894 = vrot.lane.b32.xlu0 %v887_v5, %s1338_s19 }
 0x134   :  { %v1619_v9 = vpop.permute.xlu1 %198  ;;  %v332_v21 = vrot.slane %v317_v1, 1  ;;  %v363_v1 = vsel %vm326_vm2, %v360_v33, %v362_v51  ;;  %v397_v51 = vrot.slane %v383_v41, 1 }
 0x135   :  { %v1621_v10 = vpop.permute.xlu0 %196  ;;  %v207_v4 = vadd.f32 %v1619_v9, %v149_v54 }
 0x136   :  { %932 = vrot.lane.b32.xlu1 %v924_v11, %s1338_s19  ;;  %v334_v47 = vsel %vm326_vm2, %v332_v21, %v333_v12  ;;  %v384_v21 = vmul.f32 %v1671_v2, %v1444_v59 }
 0x137   :  { %930 = vrot.lane.b32.xlu0 %v922_v15, %s1338_s19  ;;  %v329_v15 = vsel %vm326_vm2, %v327_v58, %v328_v57 }
 0x138   :  { %v1634_v23 = vpop.permute.xlu1 %220 }
 0x139   :  { %v1639_v29 = vpop.permute.xlu0 %218 }
 0x13a   :  { %936 = vrot.lane.b32.xlu1 %v929_v30, %s1338_s19 }
 0x13b   :  { %934 = vrot.lane.b32.xlu0 %v927_v34, %s1338_s19  ;;  %v351_v34 = vmul.f32 %v346_v42, %v1395_v24 }
 0x13c   :  { %v1656_v44 = vpop.permute.xlu1 %224 }
 0x13d   :  { %v1659_v49 = vpop.permute.xlu0 %222  ;;  %v365_v60 = vrot.slane %v351_v34, 1  ;;  %v154_v34 = vmul.f32 %v1651_v40, %v1399_v26 }
 0x13e   :  { %972 = vrot.lane.b32.xlu1 %v964_v52, %s1338_s19  ;;  %v204_v52 = vadd.f32 %v1606_v0, %v146_v28  ;;  %v364_v0 = vrot.slane %v350_v43, 1  ;;  %v382_v28 = vmul.f32 %v1671_v2, %v1399_v26  ;;  %v399_v43 = vrot.slane %v384_v21, 1 }
 0x13f   :  { %970 = vrot.lane.b32.xlu0 %v962_v56, %s1338_s19  ;;  %v368_v9 = vsel %vm326_vm2, %v365_v60, %v367_v62 }
 0x140   :  { %v247_v5 = vpop.permute.xlu1 %246 }
 0x141   :  { %v257_v8 = vadd.f32 %v247_v5, %v179_v61  ;;  %v245_v11 = vpop.permute.xlu0 %244  ;;  %v380_v61 = vmul.f32 %v1671_v2, %v1386_v18  ;;  %v361_v5 = vsel %vm326_vm2, %v359_v48, %v360_v33  ;;  %v155_v33 = vmul.f32 %v1651_v40, %v1395_v24 }
 0x142   :  { %v256_v14 = vadd.f32 %v245_v11, %v178_v3  ;;  %976 = vrot.lane.b32.xlu1 %v969_v7, %s1338_s19  ;;  %v381_v3 = vmul.f32 %v1671_v2, %v1436_v53  ;;  %v206_v7 = vadd.f32 %v1621_v10, %v148_v55  ;;  %v152_v11 = vmul.f32 %v1651_v40, %v1389_v20 }
 0x143   :  { %974 = vrot.lane.b32.xlu0 %v967_v6, %s1338_s19  ;;  %v1684_v19 = vadd.f32 %v331_v39, %v257_v8  ;;  %v379_v6 = vmul.f32 %v1671_v2, %v1389_v20  ;;  %v153_v8 = vmul.f32 %v1651_v40, %v1386_v18  ;;  %v232_v48 = vadd.f32 %v1659_v49, %v154_v34  ;;  %s1167_s19 = sld [smem:[#allocation9 + $0x1]] }
 0x144   :  { %v251_v30 = vpop.permute.xlu1 %250  ;;  %v1692_v31 = vadd.f32 %v329_v15, %v256_v14  ;;  %v392_v15 = vrot.slane %v380_v61, 1  ;;  %v394_v10 = vrot.slane %v381_v3, 1 }
 0x145   :  { %v259_v32 = vadd.f32 %v251_v30, %v181_v17  ;;  %v249_v50 = vpop.permute.xlu0 %248  ;;  %v366_v17 = vsel %vm326_vm2, %v364_v0, %v365_v60  ;;  %v231_v22 = vadd.f32 %v1634_v23, %v153_v8  ;;  %v391_v27 = vrot.slane %v379_v6, 1 }
 0x146   :  { %v258_v36 = vadd.f32 %v249_v50, %v180_v25  ;;  %v230_v30 = vadd.f32 %v1639_v29, %v152_v11  ;;  %v395_v23 = vsel %vm326_vm2, %v392_v15, %v394_v10 }
 0x147   :  { %v1699_v46 = vadd.f32 %v336_v37, %v259_v32  ;;  %v393_v29 = vsel %vm326_vm2, %v391_v27, %v392_v15  ;;  %v683_v27 = vstv %s1158_s13 }
 0x148   :  { %v273_v56 = vpop.permute.xlu1 %272  ;;  %v1707_v57 = vadd.f32 %v334_v47, %v258_v36  ;;  %v396_v47 = vrot.slane %v382_v28, 1 }
 0x149   :  { %v283_v58 = vadd.f32 %v273_v56, %v205_v45  ;;  %v271_v42 = vpop.permute.xlu0 %270  ;;  %v233_v45 = vadd.f32 %v1656_v44, %v155_v33 }
 0x14a   :  { %v282_v63 = vadd.f32 %v271_v42, %v204_v52  ;;  %v398_v60 = vsel %vm326_vm2, %v396_v47, %v397_v51  ;;  %v684_v47 = vmul.f32 %v683_v27, %v1389_v20 }
 0x14b   :  { %v374_v38 = vadd.f32 %v363_v1, %v283_v58  ;;  %v400_v58 = vsel %vm326_vm2, %v397_v51, %v399_v43  ;;  %v686_v43 = vmul.f32 %v683_v27, %v1436_v53 }
 0x14c   :  { %v277_v39 = vpop.permute.xlu1 %276  ;;  %v373_v12 = vadd.f32 %v361_v5, %v282_v63 }
 0x14d   :  { %v285_v13 = vadd.f32 %v277_v39, %v207_v4  ;;  %v275_v14 = vpop.permute.xlu0 %274 }
 0x14e   :  { %v284_v16 = vadd.f32 %v275_v14, %v206_v7 }
 0x14f   :  { %v376_v25 = vadd.f32 %v368_v9, %v285_v13 }
 0x150   :  { %v299_v32 = vpop.permute.xlu1 %298  ;;  %v375_v50 = vadd.f32 %v366_v17, %v284_v16 }
 0x151   :  { %v309_v35 = vadd.f32 %v299_v32, %v231_v22  ;;  %v297_v36 = vpop.permute.xlu0 %296 }
 0x152   :  { %v308_v37 = vadd.f32 %v297_v36, %v230_v30  ;;  %v685_v36 = vmul.f32 %v683_v27, %v1386_v18 }
 0x153   :  { %v406_v2 = vadd.f32 %v395_v23, %v309_v35 }
 0x154   :  { %v303_v52 = vpop.permute.xlu1 %302  ;;  %v405_v54 = vadd.f32 %v393_v29, %v308_v37 }
 0x155   :  { %v311_v55 = vadd.f32 %v303_v52, %v233_v45  ;;  %v301_v56 = vpop.permute.xlu0 %300 }
 0x156   :  { %v310_v40 = vadd.f32 %v301_v56, %v232_v48  ;;  %v697_v56 = vrot.slane %v685_v36, 2 }
 0x157   :  { %v408_v42 = vadd.f32 %v400_v58, %v311_v55  ;;  %v715_v58 = vstv %s1159_s14 }
 0x158   :  { %v436_v62 = vpop.permute.xlu1 %435  ;;  %v407_v61 = vadd.f32 %v398_v60, %v310_v40  ;;  %v688_v40 = vmul.f32 %v683_v27, %v1395_v24 }
 0x159   :  { %v446_v44 = vadd.f32 %v436_v62, %v1684_v19  ;;  %v434_v63 = vpop.permute.xlu0 %433  ;;  %v699_v62 = vrot.slane %v686_v43, 2 }
 0x15a   :  { %v445_v1 = vadd.f32 %v434_v63, %v1692_v31  ;;  %v650_v31 = vstv %s1157_s4 }
 0x15b   :  { %v655_v10 = vmul.f32 %v650_v31, %v1395_v24  ;;  %v654_v32 = vmul.f32 %v650_v31, %v1399_v26 }
 0x15c   :  { %v440_v0 = vpop.permute.xlu1 %439 }
 0x15d   :  { %v448_v49 = vadd.f32 %v440_v0, %v1699_v46  ;;  %v438_v3 = vpop.permute.xlu0 %437  ;;  %v670_v35 = vrot.slane %v655_v10, 2  ;;  %v669_v29 = vrot.slane %v654_v32, 2  ;;  %v687_v0 = vmul.f32 %v683_v27, %v1399_v26 }
 0x15e   :  { %v447_v4 = vadd.f32 %v438_v3, %v1707_v57  ;;  %v653_v57 = vmul.f32 %v650_v31, %v1436_v53 }
 0x15f   :  { %v671_v63 = vsel %vm663_vm3, %v669_v29, %v670_v35 }
 0x160   :  { %v476_v5 = vpop.permute.xlu1 %475  ;;  %v667_v22 = vrot.slane %v653_v57, 2 }
 0x161   :  { %v486_v6 = vadd.f32 %v476_v5, %v374_v38  ;;  %v474_v7 = vpop.permute.xlu0 %473  ;;  %v652_v38 = vmul.f32 %v650_v31, %v1386_v18 }
 0x162   :  { %v485_v8 = vadd.f32 %v474_v7, %v373_v12  ;;  %v651_v12 = vmul.f32 %v650_v31, %v1389_v20 }
 0x163   :  { %v665_v28 = vrot.slane %v652_v38, 2 }
 0x164   :  { %v480_v11 = vpop.permute.xlu1 %479  ;;  %v664_v30 = vrot.slane %v651_v12, 2  ;;  %v701_v12 = vrot.slane %v687_v0, 2 }
 0x165   :  { %v1747_v39 = vadd.f32 %v480_v11, %v376_v25  ;;  %v478_v13 = vpop.permute.xlu0 %477  ;;  %v656_v25 = vmul.f32 %v650_v31, %v1444_v59  ;;  %v668_v23 = vsel %vm663_vm3, %v665_v28, %v667_v22  ;;  %v702_v11 = vrot.slane %v688_v40, 2 }
 0x166   :  { %v1749_v14 = vadd.f32 %v478_v13, %v375_v50 }
 0x167   :  { %v672_v51 = vrot.slane %v656_v25, 2 }
 0x168   :  { %v516_v19 = vpop.permute.xlu1 %515 }
 0x169   :  { %v1751_v9 = vadd.f32 %v516_v19, %v406_v2  ;;  %v514_v46 = vpop.permute.xlu0 %513  ;;  %v666_v2 = vsel %vm663_vm3, %v664_v30, %v665_v28  ;;  %v673_v60 = vsel %vm663_vm3, %v670_v35, %v672_v51  ;;  %v700_v19 = vsel %vm663_vm3, %v697_v56, %v699_v62 }
 0x16a   :  { %v1753_v15 = vadd.f32 %v514_v46, %v405_v54  ;;  %v718_v46 = vmul.f32 %v715_v58, %v1436_v53  ;;  %v721_v28 = vmul.f32 %v715_v58, %v1444_v59 }
 0x16c   :  { %v520_v41 = vpop.permute.xlu1 %519  ;;  %v736_v36 = vrot.slane %v721_v28, 2 }
 0x16d   :  { %v1758_v16 = vadd.f32 %v520_v41, %v408_v42  ;;  %v518_v17 = vpop.permute.xlu0 %517  ;;  %v716_v41 = vmul.f32 %v715_v58, %v1389_v20  ;;  %v703_v20 = vsel %vm663_vm3, %v701_v12, %v702_v11 }
 0x16e   :  { %v1761_v21 = vadd.f32 %v518_v17, %v407_v61  ;;  %v689_v61 = vmul.f32 %v683_v27, %v1444_v59  ;;  %v731_v27 = vrot.slane %v718_v46, 2 }
 0x16f   :  { %v728_v32 = vrot.slane %v716_v41, 2 }
 0x170   :  { %v556_v50 = vpop.permute.xlu1 %555  ;;  %v704_v31 = vrot.slane %v689_v61, 2 }
 0x171   :  { %v566_v33 = vadd.f32 %v556_v50, %v446_v44  ;;  %v554_v34 = vpop.permute.xlu0 %553  ;;  %v719_v50 = vmul.f32 %v715_v58, %v1399_v26 }
 0x172   :  { %v565_v37 = vadd.f32 %v554_v34, %v445_v1  ;;  %v696_v1 = vrot.slane %v684_v47, 2  ;;  %v705_v53 = vsel %vm663_vm3, %v702_v11, %v704_v31 }
 0x173   :  { %v1768_v45 = vadd.f32 %v668_v23, %v566_v33  ;;  %v733_v51 = vrot.slane %v719_v50, 2 }
 0x174   :  { %v560_v48 = vpop.permute.xlu1 %559  ;;  %v1772_v52 = vadd.f32 %v666_v2, %v565_v37  ;;  %v698_v38 = vsel %vm663_vm3, %v696_v1, %v697_v56 }
 0x175   :  { %v568_v54 = vadd.f32 %v560_v48, %v448_v49  ;;  %v558_v55 = vpop.permute.xlu0 %557 }
 0x176   :  { %v567_v42 = vadd.f32 %v558_v55, %v447_v4  ;;  %v717_v4 = vmul.f32 %v715_v58, %v1386_v18 }
 0x177   :  { %v1777_v44 = vadd.f32 %v673_v60, %v568_v54 }
 0x178   :  { %v596_v3 = vpop.permute.xlu1 %595  ;;  %v1781_v49 = vadd.f32 %v671_v63, %v567_v42  ;;  %v729_v18 = vrot.slane %v717_v4, 2 }
 0x179   :  { %v606_v5 = vadd.f32 %v596_v3, %v486_v6  ;;  %v594_v7 = vpop.permute.xlu0 %593 }
 0x17a   :  { %v605_v13 = vadd.f32 %v594_v7, %v485_v8  ;;  %v720_v8 = vmul.f32 %v715_v58, %v1395_v24  ;;  %v732_v35 = vsel %vm663_vm3, %v729_v18, %v731_v27  ;;  %v730_v59 = vsel %vm663_vm3, %v728_v32, %v729_v18 }
 0x17b   :  { %v1786_v57 = vadd.f32 %v700_v19, %v606_v5  ;;  %v987_v5 = vstv %s986_s15 }
 0x17c   :  { %v600_v17 = vpop.permute.xlu1 %599  ;;  %v1790_v10 = vadd.f32 %v698_v38, %v605_v13  ;;  %v734_v23 = vrot.slane %v720_v8, 2 }
 0x17d   :  { %v608_v6 = vadd.f32 %v600_v17, %v1747_v39  ;;  %v598_v22 = vpop.permute.xlu0 %597 }
 0x17e   :  { %v607_v25 = vadd.f32 %v598_v22, %v1749_v14  ;;  %v737_v47 = vsel %vm663_vm3, %v734_v23, %v736_v36  ;;  %v735_v48 = vsel %vm663_vm3, %v733_v51, %v734_v23 }
 0x17f   :  { %v1797_v30 = vadd.f32 %v705_v53, %v608_v6 }
 0x180   :  { %v636_v33 = vpop.permute.xlu1 %635  ;;  %v1801_v39 = vadd.f32 %v703_v20, %v607_v25 }
 0x181   :  { %v646_v34 = vadd.f32 %v636_v33, %v1751_v9  ;;  %v634_v24 = vpop.permute.xlu0 %633 }
 0x182   :  { %v645_v14 = vadd.f32 %v634_v24, %v1753_v15 }
 0x183   :  { %v1806_v37 = vadd.f32 %v732_v35, %v646_v34 }
 0x184   :  { %v640_v43 = vpop.permute.xlu1 %639  ;;  %v1809_v2 = vadd.f32 %v730_v59, %v645_v14 }
 0x185   :  { %v648_v26 = vadd.f32 %v640_v43, %v1758_v16  ;;  %v638_v29 = vpop.permute.xlu0 %637 }
 0x186   :  { %v647_v9 = vadd.f32 %v638_v29, %v1761_v21  ;;  %v1055_v29 = vstv %s1168_s17 }
 0x187   :  { %v1814_v15 = vadd.f32 %v737_v47, %v648_v26 }
 0x188   :  { %v773_v54 = vpop.permute.xlu1 %772  ;;  %v1817_v55 = vadd.f32 %v735_v48, %v647_v9 }
 0x189   :  { %v771_v56 = vpop.permute.xlu0 %770  ;;  %v783_v0 = vadd.f32 %v773_v54, %v1768_v45 }
 0x18a   :  { %v782_v3 = vadd.f32 %v771_v56, %v1772_v52 }
 0x18c   :  { %v777_v40 = vpop.permute.xlu1 %776 }
 0x18d   :  { %v775_v58 = vpop.permute.xlu0 %774  ;;  %v785_v19 = vadd.f32 %v777_v40, %v1777_v44  ;;  %v1019_v44 = vstv %s1166_s16 }
 0x18e   :  { %v784_v46 = vadd.f32 %v775_v58, %v1781_v49 }
 0x190   :  { %v813_v42 = vpop.permute.xlu1 %812 }
 0x191   :  { %v811_v60 = vpop.permute.xlu0 %810  ;;  %v823_v52 = vadd.f32 %v813_v42, %v1786_v57 }
 0x192   :  { %v822_v25 = vadd.f32 %v811_v60, %v1790_v10 }
 0x194   :  { %v817_v62 = vpop.permute.xlu1 %816 }
 0x195   :  { %v815_v61 = vpop.permute.xlu0 %814  ;;  %v825_v34 = vadd.f32 %v817_v62, %v1797_v30 }
 0x196   :  { %v824_v57 = vadd.f32 %v815_v61, %v1801_v39 }
 0x198   :  { %v853_v16 = vpop.permute.xlu1 %852 }
 0x199   :  { %v851_v63 = vpop.permute.xlu0 %850  ;;  %v863_v9 = vadd.f32 %v853_v16, %v1806_v37 }
 0x19a   :  { %v862_v30 = vadd.f32 %v851_v63, %v1809_v2 }
 0x19c   :  { %v1819_v21 = vpop.permute.xlu1 %856 }
 0x19d   :  { %v1821_v1 = vpop.permute.xlu0 %854  ;;  %v865_v61 = vadd.f32 %v1819_v21, %v1814_v15 }
 0x1a0   :  { %v893_v7 = vpop.permute.xlu1 %892 }
 0x1a1   :  { %v903_v11 = vadd.f32 %v893_v7, %v783_v0  ;;  %v891_v4 = vpop.permute.xlu0 %890  ;;  %v864_v0 = vadd.f32 %v1821_v1, %v1817_v55 }
 0x1a2   :  { %v902_v13 = vadd.f32 %v891_v4, %v782_v3 }
 0x1a3   :  { %v989_v31 = vadd.f32 %v987_v5, %v903_v11 }
 0x1a4   :  { %v988_v38 = vadd.f32 %v987_v5, %v902_v13  ;;  %v897_v12 = vpop.permute.xlu1 %896 }
 0x1a5   :  { %v993_v41 = vsub.f32 0.0, %v989_v31  ;;  %v905_v17 = vadd.f32 %v897_v12, %v785_v19  ;;  %v895_v6 = vpop.permute.xlu0 %894 }
 0x1a6   :  { %v992_v22 = vsub.f32 0.0, %v988_v38  ;;  %v904_v45 = vadd.f32 %v895_v6, %v784_v46 }
 0x1a7   :  { %v998_v18 = vmul.f32 1.442695, %v993_v41  ;;  %v991_v8 = vadd.f32 %v987_v5, %v905_v17 }
 0x1a8   :  { %v996_v53 = vmul.f32 1.442695, %v992_v22  ;;  %v990_v27 = vadd.f32 %v987_v5, %v904_v45  ;;  %v933_v28 = vpop.permute.xlu1 %932 }
 0x1a9   :  { %1181 = vpow2.f32 %v998_v18  ;;  %v995_v49 = vsub.f32 0.0, %v991_v8  ;;  %v943_v20 = vadd.f32 %v933_v28, %v823_v52  ;;  %v931_v32 = vpop.permute.xlu0 %930 }
 0x1aa   :  { %1183 = vpow2.f32 %v996_v53  ;;  %v994_v50 = vsub.f32 0.0, %v990_v27  ;;  %v942_v33 = vadd.f32 %v931_v32, %v822_v25 }
 0x1ab   :  { %v1002_v24 = vmul.f32 1.442695, %v995_v49  ;;  %v1021_v14 = vadd.f32 %v1019_v44, %v943_v20 }
 0x1ac   :  { %v1000_v35 = vmul.f32 1.442695, %v994_v50  ;;  %v1020_v36 = vadd.f32 %v1019_v44, %v942_v33  ;;  %v937_v10 = vpop.permute.xlu1 %936 }
 0x1ad   :  { %v1025_v59 = vsub.f32 0.0, %v1021_v14  ;;  %v945_v23 = vadd.f32 %v937_v10, %v825_v34  ;;  %v935_v51 = vpop.permute.xlu0 %934  ;;  %1185 = vpow2.f32 %v1002_v24 }
 0x1ae   :  { %v1024_v43 = vsub.f32 0.0, %v1020_v36  ;;  %v944_v26 = vadd.f32 %v935_v51, %v824_v57  ;;  %1187 = vpow2.f32 %v1000_v35  ;;  %v1013_v35 = vstv %s1012_s18 }
 0x1af   :  { %v1030_v47 = vmul.f32 1.442695, %v1025_v59  ;;  %v1023_v48 = vadd.f32 %v1019_v44, %v945_v23  ;;  %v1045_v36 = vstv %s1167_s19 }
 0x1b0   :  { %v1028_v54 = vmul.f32 1.442695, %v1024_v43  ;;  %v1022_v56 = vadd.f32 %v1019_v44, %v944_v26  ;;  %v973_v39 = vpop.permute.xlu1 %972 }
 0x1b1   :  { %1189 = vpow2.f32 %v1030_v47  ;;  %v1027_v40 = vsub.f32 0.0, %v1023_v48  ;;  %v983_v58 = vadd.f32 %v973_v39, %v863_v9  ;;  %v971_v42 = vpop.permute.xlu0 %970 }
 0x1b2   :  { %1191 = vpow2.f32 %v1028_v54  ;;  %v1026_v60 = vsub.f32 0.0, %v1022_v56  ;;  %v982_v62 = vadd.f32 %v971_v42, %v862_v30 }
 0x1b3   :  { %v1034_v37 = vmul.f32 1.442695, %v1027_v40  ;;  %v1057_v16 = vadd.f32 %v1055_v29, %v983_v58 }
 0x1b4   :  { %v1032_v2 = vmul.f32 1.442695, %v1026_v60  ;;  %v1056_v63 = vadd.f32 %v1055_v29, %v982_v62  ;;  %v977_v3 = vpop.permute.xlu1 %976 }
 0x1b5   :  { %1193 = vpow2.f32 %v1034_v37  ;;  %v1061_v5 = vsub.f32 0.0, %v1057_v16  ;;  %v985_v7 = vadd.f32 %v977_v3, %v865_v61  ;;  %v975_v11 = vpop.permute.xlu0 %974  ;;  %v1081_v16 = vstv %s1169_s20 }
 0x1b6   :  { %v1182_v4 = vpop.eup %1181  ;;  %1195 = vpow2.f32 %v1032_v2  ;;  %v1060_v13 = vsub.f32 0.0, %v1056_v63  ;;  %v984_v19 = vadd.f32 %v975_v11, %v864_v0 }
 0x1b7   :  { %v1184_v31 = vpop.eup %1183  ;;  %v1066_v46 = vmul.f32 1.442695, %v1061_v5  ;;  %v1059_v38 = vadd.f32 %v1055_v29, %v985_v7  ;;  %v1005_v12 = vadd.f32 1.0, %v1182_v4  ;;  %v1091_v5 = vstv %s1849_s3  ;;  %s1339_s3 = smov [#allocation11]  }
 0x1b8   :  { %v1064_v15 = vmul.f32 1.442695, %v1060_v13  ;;  %v1058_v21 = vadd.f32 %v1055_v29, %v984_v19  ;;  %v1004_v17 = vadd.f32 1.0, %v1184_v31  ;;  %s1126_s23 = sshll.u32 %s1339_s3, 4  ;;  %s1127_s23 = int_to_ptr.vmem [resolvable:$true] %s1126_s23 }
 0x1b9   :  { %v1063_v41 = vsub.f32 0.0, %v1059_v38  ;;  %1197 = vpow2.f32 %v1066_v46  ;;  %s1301_s24 = scalar_lea.vmem %s1127_s23, 512  ;;  %p1306_p7 = scmp.lt.s32.totalorder %s1127_s23, %s1127_s23 }
 0x1ba   :  { %v1062_v55 = vsub.f32 0.0, %v1058_v21  ;;  %v1186_v6 = vpop.eup %1185  ;;  %1199 = vpow2.f32 %v1064_v15  ;;  %p1302_p6 = scmp.ne.s32.totalorder %s1127_s23, %s1301_s24  ;;  %p1307_p8 = scmp.lt.s32.totalorder %s1301_s24, %s1301_s24 }
 0x1bb   :  { %v1070_v1 = vmul.f32 1.442695, %v1063_v41  ;;  %v1188_v45 = vpop.eup %1187  ;;  %1201 = vrcp.f32 %v1005_v12  ;;  %v1007_v8 = vadd.f32 1.0, %v1186_v6 }
 0x1bc   :  { %v1068_v22 = vmul.f32 1.442695, %v1062_v55  ;;  %1203 = vrcp.f32 %v1004_v17  ;;  %v1006_v53 = vadd.f32 1.0, %v1188_v45  ;;  %p1308_p9 = por %p1307_p8, %p1306_p7 }
 0x1bd   :  { %1205 = vpow2.f32 %v1070_v1 }
 0x1be   :  { %v1190_v52 = vpop.eup %1189  ;;  %1207 = vpow2.f32 %v1068_v22  ;;  %p1309_p10 = pnand %p1308_p9, %p1302_p6 }
 0x1bf   :  { %v1192_v18 = vpop.eup %1191  ;;  %v1037_v25 = vadd.f32 1.0, %v1190_v52 }
 0x1c0   :  { %v1036_v27 = vadd.f32 1.0, %v1192_v18 }
 0x1c1   :  { %1209 = vrcp.f32 %v1037_v25 }
 0x1c2   :  { %v1194_v44 = vpop.eup %1193  ;;  %1211 = vrcp.f32 %v1036_v27 }
 0x1c3   :  { %v1196_v28 = vpop.eup %1195  ;;  %1213 = vrcp.f32 %v1007_v8  ;;  %v1039_v49 = vadd.f32 1.0, %v1194_v44 }
 0x1c4   :  { %1215 = vrcp.f32 %v1006_v53  ;;  %v1038_v20 = vadd.f32 1.0, %v1196_v28 }
 0x1c5   :  { %1217 = vrcp.f32 %v1039_v49 }
 0x1c6   :  { %1219 = vrcp.f32 %v1038_v20  ;;  %v1198_v32 = vpop.eup %1197 }
 0x1c7   :  { %v1200_v50 = vpop.eup %1199  ;;  %v1073_v33 = vadd.f32 1.0, %v1198_v32 }
 0x1c8   :  { %v1202_v34 = vpop.eup %1201  ;;  %v1072_v24 = vadd.f32 1.0, %v1200_v50 }
 0x1c9   :  { %v1204_v14 = vpop.eup %1203  ;;  %1221 = vrcp.f32 %v1073_v33  ;;  %v1015_v26 = vmul.f32 %v1202_v34, %v1013_v35 }
 0x1ca   :  { %v1206_v57 = vpop.eup %1205  ;;  %1223 = vrcp.f32 %v1072_v24  ;;  %v1014_v47 = vmul.f32 %v1204_v14, %v1013_v35 }
 0x1cb   :  { %v1208_v10 = vpop.eup %1207  ;;  %v1075_v59 = vadd.f32 1.0, %v1206_v57 }
 0x1cc   :  { %v1074_v51 = vadd.f32 1.0, %v1208_v10 }
 0x1cd   :  { %1225 = vrcp.f32 %v1075_v59 }
 0x1ce   :  { %v1210_v23 = vpop.eup %1209  ;;  %1227 = vrcp.f32 %v1074_v51 }
 0x1cf   :  { %v1212_v43 = vpop.eup %1211  ;;  %v1047_v29 = vmul.f32 %v1210_v23, %v1045_v36 }
 0x1d0   :  { %v1214_v9 = vpop.eup %1213  ;;  %v1046_v48 = vmul.f32 %v1212_v43, %v1045_v36 }
 0x1d1   :  { %v1216_v30 = vpop.eup %1215  ;;  %v1051_v54 = vadd.f32 %v1047_v29, %v1015_v26  ;;  %v1017_v58 = vmul.f32 %v1214_v9, %v1013_v35 }
 0x1d2   :  { %v1218_v56 = vpop.eup %1217  ;;  %v1050_v39 = vadd.f32 %v1046_v48, %v1014_v47  ;;  %v1016_v60 = vmul.f32 %v1216_v30, %v1013_v35 }
 0x1d3   :  { %v1220_v40 = vpop.eup %1219  ;;  %v1049_v42 = vmul.f32 %v1218_v56, %v1045_v36 }
 0x1d4   :  { %v1048_v62 = vmul.f32 %v1220_v40, %v1045_v36 }
 0x1d5   :  { %v1053_v61 = vadd.f32 %v1049_v42, %v1017_v58 }
 0x1d6   :  { %v1052_v37 = vadd.f32 %v1048_v62, %v1016_v60  ;;  %v1222_v0 = vpop.eup %1221 }
 0x1d7   :  { %v1224_v2 = vpop.eup %1223  ;;  %v1083_v63 = vmul.f32 %v1222_v0, %v1081_v16 }
 0x1d8   :  { %v1082_v3 = vmul.f32 %v1224_v2, %v1081_v16 }
 0x1d9   :  { %v1087_v7 = vadd.f32 %v1083_v63, %v1051_v54 }
 0x1da   :  { %v1226_v11 = vpop.eup %1225  ;;  %v1086_v4 = vadd.f32 %v1082_v3, %v1050_v39 }
 0x1db   :  { %v1228_v13 = vpop.eup %1227  ;;  %v1085_v19 = vmul.f32 %v1226_v11, %v1081_v16  ;;  %v1093_v31 = vadd.f32 %v1091_v5, %v1087_v7 }
 0x1dc   :  { %v1084_v46 = vmul.f32 %v1228_v13, %v1081_v16  ;;  %v1092_v38 = vadd.f32 %v1091_v5, %v1086_v4 }
 0x1dd   :  { %v1089_v15 = vadd.f32 %v1085_v19, %v1053_v61  ;;  %v1097_v21 = vsub.f32 0.0, %v1093_v31 }
 0x1de   :  { %v1088_v12 = vadd.f32 %v1084_v46, %v1052_v37  ;;  %v1096_v41 = vsub.f32 0.0, %v1092_v38 }
 0x1df   :  { %v1095_v17 = vadd.f32 %v1091_v5, %v1089_v15  ;;  %v1102_v55 = vmul.f32 1.442695, %v1097_v21 }
 0x1e0   :  { %v1094_v1 = vadd.f32 %v1091_v5, %v1088_v12  ;;  %v1100_v6 = vmul.f32 1.442695, %v1096_v41 }
 0x1e1   :  { %v1099_v22 = vsub.f32 0.0, %v1095_v17  ;;  %1229 = vpow2.f32 %v1102_v55 }
 0x1e2   :  { %v1098_v45 = vsub.f32 0.0, %v1094_v1  ;;  %1231 = vpow2.f32 %v1100_v6 }
 0x1e3   :  { %v1106_v52 = vmul.f32 1.442695, %v1099_v22 }
 0x1e4   :  { %v1104_v18 = vmul.f32 1.442695, %v1098_v45 }
 0x1e5   :  { %1233 = vpow2.f32 %v1106_v52 }
 0x1e6   :  { %1235 = vpow2.f32 %v1104_v18 }
 0x1ee   :  { %v1230_v8 = vpop.eup %1229 }
 0x1ef   :  { %v1232_v25 = vpop.eup %1231  ;;  %v1109_v53 = vadd.f32 1.0, %v1230_v8 }
 0x1f0   :  { %v1108_v27 = vadd.f32 1.0, %v1232_v25 }
 0x1f1   :  { %1237 = vrcp.f32 %v1109_v53 }
 0x1f2   :  { %v1234_v44 = vpop.eup %1233  ;;  %1239 = vrcp.f32 %v1108_v27 }
 0x1f3   :  { %v1236_v28 = vpop.eup %1235  ;;  %v1111_v49 = vadd.f32 1.0, %v1234_v44 }
 0x1f4   :  { %v1110_v20 = vadd.f32 1.0, %v1236_v28 }
 0x1f5   :  { %1241 = vrcp.f32 %v1111_v49 }
 0x1f6   :  { %1243 = vrcp.f32 %v1110_v20 }
 0x1fe   :  { %v1238_v32 = vpop.eup %1237 }
 0x1ff   :  { %v1240_v50 = vpop.eup %1239  ;;  %1118 = vst.msk [vmem:[#allocation11 + $0x8] sm:$0xff] %vm1116_vm4, %v1238_v32 }
 0x200   :  { %1117 = vst.msk [vmem:[#allocation11] sm:$0xff] %vm1116_vm4, %v1240_v50 }
 0x202   :  { %v1242_v33 = vpop.eup %1241 }
 0x203   :  { %v1244_v34 = vpop.eup %1243  ;;  %1120 = vst.msk [vmem:[#allocation11 + $0x18] sm:$0xff] %vm1116_vm4, %v1242_v33 }
 0x204   :  { %1119 = vst.msk [vmem:[#allocation11 + $0x10] sm:$0xff] %vm1116_vm4, %v1244_v34 }
 0x205   :  { %1312 = shalt.err (!%p1309_p10)
}
 0x206   :  { %1132 = dma.vmem_to_hbm [thread:$0]  %s1127_s23, 512, %s1851_s5, [#allocation5], %s1333_s2, %s1333_s2, %s1334_s9  }
 0x207   :  { %1327 = dma.done.wait [#allocation5], 512  }
 0x208   :  { %1328 = vsyncadd [#allocation5], 4294966784 }
 0x209   :  { %1136 = vsyncpa [#allocation4], 1 }
 0x20a   :  { %1137 = vsyncpa [#allocation5], 1 }
 0x20b   :  { %1138 = vsyncpa [#allocation6], 1 }
 0x20c   :  { %1139 = vsyncpa [#allocation8], 1 }

</bundles_post_ra>
